<compile_context>
chip_gen: v7x
topology: tpu7x:2x2x1
jax: 0.10.0
libtpu: 0.0.40
codegen_flags: <defaults>
</compile_context>

<pallas_src>
import functools

import jax
import jax.numpy as jnp
from jax.experimental import pallas as pl
from jax.experimental.pallas import tpu as pltpu

# ----- "constants" + model_config (synthetic, small) ------------------------
TRIM_END = 512
AUG_SUBSAMPLE_SIZE = 16
INPUT_SIZE = TRIM_END // AUG_SUBSAMPLE_SIZE   # 32  (features per electrode)
NUM_ELECTRODES = 8                            # sequence length of the GRU
NUM_CLASSES = 4

N_LAYERS = 2
HIDDEN_SIZE = 32
BATCH_SIZE = 4
BATCH_PAD = 8                                 # sublane count


# ------------------------- fused forward-pass kernel -------------------------
def fused_rnn_kernel(x_ref, h0_ref, *refs, n_layers, seq_len, batch_pad, hidden):
    """Fused GRU stack + linear decoder, single invocation, wavefront schedule.

    x_ref     : (T*Bp, D_in) time-major rows (row = t*Bp + b), float32
    h0_ref    : (n_layers, Bp, H)
    per layer : slab (D_l + H + 2, 3H):
                  rows [0:D_l]       = W_ih fused (r|z|n), pre-transposed (x @ W)
                  rows [D_l:D_l+H]   = W_hh fused (r|z|n)
                  row  D_l+H         = input-side bias (bhh_r, bhh_z folded in)
                  row  D_l+H+1       = hidden-side n-gate bias in lanes [2H:3H]
    dec slab  : (T*H + 1, C), last row = decoder bias
    o_ref     : (Bp, C)
    """
    layer_refs = refs[:n_layers]
    dec_ref = refs[n_layers]
    o_ref = refs[n_layers + 1]

    T, B, H = seq_len, batch_pad, hidden
    H3 = 3 * H
    C = o_ref.shape[-1]

    # ---- unpack each layer's weight slab ONCE (outside the recurrence) -----
    wih, whh, bi_b, bhn_b = [], [], [], []
    for l in range(n_layers):
        w = layer_refs[l][...]                      # (D_l + H + 2, 3H)
        d_l = w.shape[0] - H - 2
        wih.append(w[:d_l, :])                      # (D_l, 3H)
        whh.append(w[d_l:d_l + H, :])               # (H, 3H)
        # Pre-broadcast biases once (JAX does not CSE broadcasts in loops).
        bi_b.append(jnp.broadcast_to(w[d_l + H:d_l + H + 1, :], (B, H3)))
        bhn_b.append(jnp.broadcast_to(w[d_l + H + 1:d_l + H + 2, 2 * H:], (B, H)))

    # ---- hoisted layer-0 input projection: ONE fused matmul + bias ---------
    x = x_ref[...]                                  # (T*B, D0)
    gi0 = (jnp.dot(x, wih[0], preferred_element_type=jnp.float32)
           + layer_refs[0][...][x.shape[1] + H:x.shape[1] + H + 1, :])  # (T*B, 3H)

    # ---- decoder weights; accumulator starts from the decoder bias ---------
    dec = dec_ref[...]                              # (T*H + 1, C)
    acc = jnp.broadcast_to(dec[T * H:, :], (B, C))  # (B, C)

    # ---- initial hidden states ----------------------------------------------
    h = [h0_ref[l] for l in range(n_layers)]        # each (B, H)

    def gru_step(gi_t, h_prev, whh_l, bhn_l):
        # One fused recurrent matmul per step; gates via static lane slices.
        gh = jnp.dot(h_prev, whh_l, preferred_element_type=jnp.float32)   # (B, 3H)
        r = jax.nn.sigmoid(gi_t[:, :H] + gh[:, :H])
        z = jax.nn.sigmoid(gi_t[:, H:2 * H] + gh[:, H:2 * H])
        n = jnp.tanh(gi_t[:, 2 * H:] + r * (gh[:, 2 * H:] + bhn_l))
        return (1.0 - z) * n + z * h_prev

    # ---- wavefront: layers + decoder interleaved in one unrolled loop ------
    for t in range(T):
        lo = t * B                                   # 8-aligned (B == 8)
        h[0] = gru_step(gi0[lo:lo + B, :], h[0], whh[0], bhn_b[0])
        for l in range(1, n_layers):
            gi_t = (jnp.dot(h[l - 1], wih[l], preferred_element_type=jnp.float32)
                    + bi_b[l])
            h[l] = gru_step(gi_t, h[l], whh[l], bhn_b[l])
        # Decoder partial product: independent work, free MXU filler.
        acc = acc + jnp.dot(h[n_layers - 1], dec[t * H:(t + 1) * H, :],
                            preferred_element_type=jnp.float32)

    o_ref[...] = acc


# ------------------------------ host-side packing ----------------------------
def pack_layer(wih, whh, bih, bhh, hidden):
    """Build one (D+H+2, 3H) slab per layer; gate order (r, z, n).

    bhh_r / bhh_z are folded into the input-side bias (exact for GRU);
    bhh_n stays on its own row (it multiplies with r inside the n gate).
    """
    H = hidden
    wih_f = jnp.concatenate([wih[0], wih[1], wih[2]], axis=1)               # (D, 3H)
    whh_f = jnp.concatenate([whh[0], whh[1], whh[2]], axis=1)               # (H, 3H)
    bi = jnp.concatenate([bih[0] + bhh[0], bih[1] + bhh[1], bih[2]], axis=1)  # (1, 3H)
    bhn = jnp.concatenate([jnp.zeros((1, 2 * H), jnp.float32), bhh[2]], axis=1)
    return jnp.concatenate([wih_f, whh_f, bi, bhn], axis=0)                 # (D+H+2, 3H)


def rnn_forward(inputs, gru_params, dec_w, dec_b, h0_all):
    """inputs: (B, T, D) batch_first, like the PyTorch module."""
    B, T, D = inputs.shape
    H = h0_all.shape[-1]
    C = dec_w.shape[-1]
    Bp = max(BATCH_PAD, B)

    # Pad batch to the sublane count and lay out time-major rows (row = t*Bp + b).
    x = jnp.pad(inputs.astype(jnp.float32), ((0, Bp - B), (0, 0), (0, 0)))
    x2d = jnp.transpose(x, (1, 0, 2)).reshape(T * Bp, D)
    h0 = jnp.pad(h0_all, ((0, 0), (0, Bp - B), (0, 0)))

    slabs = [pack_layer(*p, hidden=H) for p in gru_params]
    dec_packed = jnp.concatenate([dec_w, dec_b], axis=0)     # (T*H + 1, C)

    kernel = functools.partial(fused_rnn_kernel, n_layers=len(gru_params),
                               seq_len=T, batch_pad=Bp, hidden=H)
    n_in = 2 + len(slabs) + 1
    out = pl.pallas_call(
        kernel,
        out_shape=jax.ShapeDtypeStruct((Bp, C), jnp.float32),
        # Whole-array VMEM residency (total footprint << 100 KiB); no grid.
        in_specs=[pl.BlockSpec(memory_space=pltpu.MemorySpace.VMEM)] * n_in,
        out_specs=pl.BlockSpec(memory_space=pltpu.MemorySpace.VMEM),
    )(x2d, h0, *slabs, dec_packed)
    return out[:B]


# ------------------------------ reference (JAX) ------------------------------
def rnn_forward_ref(inputs, gru_params, dec_w, dec_b, h0_all):
    x = inputs.astype(jnp.float32)
    for layer, (wih, whh, bih, bhh) in enumerate(gru_params):
        def step(h, xt, wih=wih, whh=whh, bih=bih, bhh=bhh):
            gi_r = xt @ wih[0] + bih[0]
            gi_z = xt @ wih[1] + bih[1]
            gi_n = xt @ wih[2] + bih[2]
            gh_r = h @ whh[0] + bhh[0]
            gh_z = h @ whh[1] + bhh[1]
            gh_n = h @ whh[2] + bhh[2]
            r = jax.nn.sigmoid(gi_r + gh_r)
            z = jax.nn.sigmoid(gi_z + gh_z)
            n = jnp.tanh(gi_n + r * gh_n)
            h_new = (1.0 - z) * n + z * h
            return h_new, h_new

        _, ys = jax.lax.scan(step, h0_all[layer], jnp.transpose(x, (1, 0, 2)))
        x = jnp.transpose(ys, (1, 0, 2))
    flat = x.reshape(x.shape[0], -1)
    return flat @ dec_w + dec_b


# ----------------------------------- main ------------------------------------
def init_params(key):
    """Deterministic init matching PyTorch shapes (uniform +/- 1/sqrt(H)),
    stored per-gate (r, z, n) and pre-transposed so the kernel does x @ W."""
    k = 1.0 / jnp.sqrt(jnp.float32(HIDDEN_SIZE))
    gru_params = []
    for layer in range(N_LAYERS):
        d_in = INPUT_SIZE if layer == 0 else HIDDEN_SIZE
        key, k1, k2, k3, k4 = jax.random.split(key, 5)
        wih = jax.random.uniform(k1, (3, d_in, HIDDEN_SIZE), jnp.float32, -k, k)
        whh = jax.random.uniform(k2, (3, HIDDEN_SIZE, HIDDEN_SIZE), jnp.float32, -k, k)
        bih = jax.random.uniform(k3, (3, 1, HIDDEN_SIZE), jnp.float32, -k, k)
        bhh = jax.random.uniform(k4, (3, 1, HIDDEN_SIZE), jnp.float32, -k, k)
        gru_params.append((wih, whh, bih, bhh))
    key, k1, k2, k3 = jax.random.split(key, 4)
    fan_in = HIDDEN_SIZE * NUM_ELECTRODES
    kd = 1.0 / jnp.sqrt(jnp.float32(fan_in))
    dec_w = jax.random.uniform(k1, (fan_in, NUM_CLASSES), jnp.float32, -kd, kd)
    dec_b = jax.random.uniform(k2, (1, NUM_CLASSES), jnp.float32, -kd, kd)
    # init_hidden(): randn(n_layers, batch, hidden) — made deterministic here.
    h0_all = jax.random.normal(k3, (N_LAYERS, BATCH_SIZE, HIDDEN_SIZE), jnp.float32)
    return gru_params, dec_w, dec_b, h0_all


if __name__ == "__main__":
    key = jax.random.PRNGKey(0)
    key, k_in = jax.random.split(key)
    # inputs: (batch, NUM_ELECTRODES, TRIM_END // AUG_SUBSAMPLE_SIZE)
    inputs = jax.random.normal(k_in, (BATCH_SIZE, NUM_ELECTRODES, INPUT_SIZE),
                               jnp.float32)
    gru_params, dec_w, dec_b, h0_all = init_params(key)

    fwd = jax.jit(rnn_forward)
    out = fwd(inputs, gru_params, dec_w, dec_b, h0_all)
    out = jax.block_until_ready(out)

    ref = rnn_forward_ref(inputs, gru_params, dec_w, dec_b, h0_all)
    assert out.shape == (BATCH_SIZE, NUM_CLASSES)
    assert jnp.allclose(out, ref, atol=1e-4, rtol=1e-4), "mismatch vs reference"

    print("KERNEL_OK")
</pallas_src>

<mosaic_0001>
module attributes {stable_mosaic.version = 11 : i64} {
  func.func @fused_rnn_kernel(%arg0: memref<64x32xf32, #tpu.memory_space<vmem>>, %arg1: memref<2x8x32xf32, #tpu.memory_space<vmem>>, %arg2: memref<66x96xf32, #tpu.memory_space<vmem>>, %arg3: memref<66x96xf32, #tpu.memory_space<vmem>>, %arg4: memref<257x4xf32, #tpu.memory_space<vmem>>, %arg5: memref<8x4xf32, #tpu.memory_space<vmem>>) attributes {dimension_semantics = [], scalar_prefetch = 0 : i64, scratch_operands = 0 : i64, tpu.core_type = #tpu.core_type<tc>} {
    %c0 = arith.constant 0 : index
    %c0_0 = arith.constant 0 : index
    %0 = vector.load %arg2[%c0, %c0_0] : memref<66x96xf32, #tpu.memory_space<vmem>>, vector<66x96xf32>
    %1 = vector.extract_strided_slice %0 {offsets = [0, 0], sizes = [32, 96], strides = [1, 1]} : vector<66x96xf32> to vector<32x96xf32>
    %2 = vector.extract_strided_slice %0 {offsets = [32, 0], sizes = [32, 96], strides = [1, 1]} : vector<66x96xf32> to vector<32x96xf32>
    %3 = vector.extract_strided_slice %0 {offsets = [65, 64], sizes = [1, 32], strides = [1, 1]} : vector<66x96xf32> to vector<1x32xf32>
    %4 = vector.shape_cast %3 : vector<1x32xf32> to vector<1x32xf32>
    %5 = vector.broadcast %4 : vector<1x32xf32> to vector<8x32xf32>
    %c0_1 = arith.constant 0 : index
    %c0_2 = arith.constant 0 : index
    %6 = vector.load %arg3[%c0_1, %c0_2] : memref<66x96xf32, #tpu.memory_space<vmem>>, vector<66x96xf32>
    %7 = vector.extract_strided_slice %6 {offsets = [0, 0], sizes = [32, 96], strides = [1, 1]} : vector<66x96xf32> to vector<32x96xf32>
    %8 = vector.extract_strided_slice %6 {offsets = [32, 0], sizes = [32, 96], strides = [1, 1]} : vector<66x96xf32> to vector<32x96xf32>
    %9 = vector.extract_strided_slice %6 {offsets = [64, 0], sizes = [1, 96], strides = [1, 1]} : vector<66x96xf32> to vector<1x96xf32>
    %10 = vector.shape_cast %9 : vector<1x96xf32> to vector<1x96xf32>
    %11 = vector.broadcast %10 : vector<1x96xf32> to vector<8x96xf32>
    %12 = vector.extract_strided_slice %6 {offsets = [65, 64], sizes = [1, 32], strides = [1, 1]} : vector<66x96xf32> to vector<1x32xf32>
    %13 = vector.shape_cast %12 : vector<1x32xf32> to vector<1x32xf32>
    %14 = vector.broadcast %13 : vector<1x32xf32> to vector<8x32xf32>
    %c0_3 = arith.constant 0 : index
    %c0_4 = arith.constant 0 : index
    %15 = vector.load %arg0[%c0_3, %c0_4] : memref<64x32xf32, #tpu.memory_space<vmem>>, vector<64x32xf32>
    %cst = arith.constant dense<0.000000e+00> : vector<64x96xf32>
    %16 = tpu.matmul %15, %1, %cst {dimension_numbers = #tpu.dot_dimension_numbers<[1], [0], [0], [1], [0, 0, 1, 1], [], []>} : vector<64x32xf32>, vector<32x96xf32>, vector<64x96xf32> -> vector<64x96xf32>
    %c0_5 = arith.constant 0 : index
    %c0_6 = arith.constant 0 : index
    %17 = vector.load %arg2[%c0_5, %c0_6] : memref<66x96xf32, #tpu.memory_space<vmem>>, vector<66x96xf32>
    %18 = vector.extract_strided_slice %17 {offsets = [64, 0], sizes = [1, 96], strides = [1, 1]} : vector<66x96xf32> to vector<1x96xf32>
    %19 = vector.broadcast %18 : vector<1x96xf32> to vector<64x96xf32>
    %20 = arith.addf %16, %19 : vector<64x96xf32>
    %c0_7 = arith.constant 0 : index
    %c0_8 = arith.constant 0 : index
    %21 = vector.load %arg4[%c0_7, %c0_8] : memref<257x4xf32, #tpu.memory_space<vmem>>, vector<257x4xf32>
    %22 = vector.extract_strided_slice %21 {offsets = [256, 0], sizes = [1, 4], strides = [1, 1]} : vector<257x4xf32> to vector<1x4xf32>
    %23 = vector.shape_cast %22 : vector<1x4xf32> to vector<1x4xf32>
    %24 = vector.broadcast %23 : vector<1x4xf32> to vector<8x4xf32>
    %c0_9 = arith.constant 0 : index
    %c0_10 = arith.constant 0 : index
    %c0_11 = arith.constant 0 : index
    %25 = vector.load %arg1[%c0_9, %c0_10, %c0_11] : memref<2x8x32xf32, #tpu.memory_space<vmem>>, vector<1x8x32xf32>
    %26 = vector.shape_cast %25 : vector<1x8x32xf32> to vector<8x32xf32>
    %c1 = arith.constant 1 : index
    %c0_12 = arith.constant 0 : index
    %c0_13 = arith.constant 0 : index
    %27 = vector.load %arg1[%c1, %c0_12, %c0_13] : memref<2x8x32xf32, #tpu.memory_space<vmem>>, vector<1x8x32xf32>
    %28 = vector.shape_cast %27 : vector<1x8x32xf32> to vector<8x32xf32>
    %29 = vector.extract_strided_slice %20 {offsets = [0, 0], sizes = [8, 96], strides = [1, 1]} : vector<64x96xf32> to vector<8x96xf32>
    %cst_14 = arith.constant dense<0.000000e+00> : vector<8x96xf32>
    %30 = tpu.matmul %26, %2, %cst_14 {dimension_numbers = #tpu.dot_dimension_numbers<[1], [0], [0], [1], [0, 0, 1, 1], [], []>} : vector<8x32xf32>, vector<32x96xf32>, vector<8x96xf32> -> vector<8x96xf32>
    %31 = vector.extract_strided_slice %29 {offsets = [0, 0], sizes = [8, 32], strides = [1, 1]} : vector<8x96xf32> to vector<8x32xf32>
    %32 = vector.extract_strided_slice %30 {offsets = [0, 0], sizes = [8, 32], strides = [1, 1]} : vector<8x96xf32> to vector<8x32xf32>
    %33 = arith.addf %31, %32 : vector<8x32xf32>
    %34 = arith.negf %33 : vector<8x32xf32>
    %35 = math.exp %34 : vector<8x32xf32>
    %cst_15 = arith.constant 1.000000e+00 : f32
    %36 = vector.broadcast %cst_15 : f32 to vector<8x32xf32>
    %37 = arith.addf %36, %35 : vector<8x32xf32>
    %38 = arith.divf %36, %37 : vector<8x32xf32>
    %39 = vector.extract_strided_slice %29 {offsets = [0, 32], sizes = [8, 32], strides = [1, 1]} : vector<8x96xf32> to vector<8x32xf32>
    %40 = vector.extract_strided_slice %30 {offsets = [0, 32], sizes = [8, 32], strides = [1, 1]} : vector<8x96xf32> to vector<8x32xf32>
    %41 = arith.addf %39, %40 : vector<8x32xf32>
    %42 = arith.negf %41 : vector<8x32xf32>
    %43 = math.exp %42 : vector<8x32xf32>
    %cst_16 = arith.constant 1.000000e+00 : f32
    %44 = vector.broadcast %cst_16 : f32 to vector<8x32xf32>
    %45 = arith.addf %44, %43 : vector<8x32xf32>
    %46 = arith.divf %44, %45 : vector<8x32xf32>
    %47 = vector.extract_strided_slice %29 {offsets = [0, 64], sizes = [8, 32], strides = [1, 1]} : vector<8x96xf32> to vector<8x32xf32>
    %48 = vector.extract_strided_slice %30 {offsets = [0, 64], sizes = [8, 32], strides = [1, 1]} : vector<8x96xf32> to vector<8x32xf32>
    %49 = arith.addf %48, %5 : vector<8x32xf32>
    %50 = arith.mulf %38, %49 : vector<8x32xf32>
    %51 = arith.addf %47, %50 : vector<8x32xf32>
    %52 = math.tanh %51 : vector<8x32xf32>
    %cst_17 = arith.constant 1.000000e+00 : f32
    %53 = vector.broadcast %cst_17 : f32 to vector<8x32xf32>
    %54 = arith.subf %53, %46 : vector<8x32xf32>
    %55 = arith.mulf %54, %52 : vector<8x32xf32>
    %56 = arith.mulf %46, %26 : vector<8x32xf32>
    %57 = arith.addf %55, %56 : vector<8x32xf32>
    %cst_18 = arith.constant dense<0.000000e+00> : vector<8x96xf32>
    %58 = tpu.matmul %57, %7, %cst_18 {dimension_numbers = #tpu.dot_dimension_numbers<[1], [0], [0], [1], [0, 0, 1, 1], [], []>} : vector<8x32xf32>, vector<32x96xf32>, vector<8x96xf32> -> vector<8x96xf32>
    %59 = arith.addf %58, %11 : vector<8x96xf32>
    %cst_19 = arith.constant dense<0.000000e+00> : vector<8x96xf32>
    %60 = tpu.matmul %28, %8, %cst_19 {dimension_numbers = #tpu.dot_dimension_numbers<[1], [0], [0], [1], [0, 0, 1, 1], [], []>} : vector<8x32xf32>, vector<32x96xf32>, vector<8x96xf32> -> vector<8x96xf32>
    %61 = vector.extract_strided_slice %59 {offsets = [0, 0], sizes = [8, 32], strides = [1, 1]} : vector<8x96xf32> to vector<8x32xf32>
    %62 = vector.extract_strided_slice %60 {offsets = [0, 0], sizes = [8, 32], strides = [1, 1]} : vector<8x96xf32> to vector<8x32xf32>
    %63 = arith.addf %61, %62 : vector<8x32xf32>
    %64 = arith.negf %63 : vector<8x32xf32>
    %65 = math.exp %64 : vector<8x32xf32>
    %cst_20 = arith.constant 1.000000e+00 : f32
    %66 = vector.broadcast %cst_20 : f32 to vector<8x32xf32>
    %67 = arith.addf %66, %65 : vector<8x32xf32>
    %68 = arith.divf %66, %67 : vector<8x32xf32>
    %69 = vector.extract_strided_slice %59 {offsets = [0, 32], sizes = [8, 32], strides = [1, 1]} : vector<8x96xf32> to vector<8x32xf32>
    %70 = vector.extract_strided_slice %60 {offsets = [0, 32], sizes = [8, 32], strides = [1, 1]} : vector<8x96xf32> to vector<8x32xf32>
    %71 = arith.addf %69, %70 : vector<8x32xf32>
    %72 = arith.negf %71 : vector<8x32xf32>
    %73 = math.exp %72 : vector<8x32xf32>
    %cst_21 = arith.constant 1.000000e+00 : f32
    %74 = vector.broadcast %cst_21 : f32 to vector<8x32xf32>
    %75 = arith.addf %74, %73 : vector<8x32xf32>
    %76 = arith.divf %74, %75 : vector<8x32xf32>
    %77 = vector.extract_strided_slice %59 {offsets = [0, 64], sizes = [8, 32], strides = [1, 1]} : vector<8x96xf32> to vector<8x32xf32>
    %78 = vector.extract_strided_slice %60 {offsets = [0, 64], sizes = [8, 32], strides = [1, 1]} : vector<8x96xf32> to vector<8x32xf32>
    %79 = arith.addf %78, %14 : vector<8x32xf32>
    %80 = arith.mulf %68, %79 : vector<8x32xf32>
    %81 = arith.addf %77, %80 : vector<8x32xf32>
    %82 = math.tanh %81 : vector<8x32xf32>
    %cst_22 = arith.constant 1.000000e+00 : f32
    %83 = vector.broadcast %cst_22 : f32 to vector<8x32xf32>
    %84 = arith.subf %83, %76 : vector<8x32xf32>
    %85 = arith.mulf %84, %82 : vector<8x32xf32>
    %86 = arith.mulf %76, %28 : vector<8x32xf32>
    %87 = arith.addf %85, %86 : vector<8x32xf32>
    %88 = vector.extract_strided_slice %21 {offsets = [0, 0], sizes = [32, 4], strides = [1, 1]} : vector<257x4xf32> to vector<32x4xf32>
    %cst_23 = arith.constant dense<0.000000e+00> : vector<8x4xf32>
    %89 = tpu.matmul %87, %88, %cst_23 {dimension_numbers = #tpu.dot_dimension_numbers<[1], [0], [0], [1], [0, 0, 1, 1], [], []>} : vector<8x32xf32>, vector<32x4xf32>, vector<8x4xf32> -> vector<8x4xf32>
    %90 = arith.addf %24, %89 : vector<8x4xf32>
    %91 = vector.extract_strided_slice %20 {offsets = [8, 0], sizes = [8, 96], strides = [1, 1]} : vector<64x96xf32> to vector<8x96xf32>
    %cst_24 = arith.constant dense<0.000000e+00> : vector<8x96xf32>
    %92 = tpu.matmul %57, %2, %cst_24 {dimension_numbers = #tpu.dot_dimension_numbers<[1], [0], [0], [1], [0, 0, 1, 1], [], []>} : vector<8x32xf32>, vector<32x96xf32>, vector<8x96xf32> -> vector<8x96xf32>
    %93 = vector.extract_strided_slice %91 {offsets = [0, 0], sizes = [8, 32], strides = [1, 1]} : vector<8x96xf32> to vector<8x32xf32>
    %94 = vector.extract_strided_slice %92 {offsets = [0, 0], sizes = [8, 32], strides = [1, 1]} : vector<8x96xf32> to vector<8x32xf32>
    %95 = arith.addf %93, %94 : vector<8x32xf32>
    %96 = arith.negf %95 : vector<8x32xf32>
    %97 = math.exp %96 : vector<8x32xf32>
    %cst_25 = arith.constant 1.000000e+00 : f32
    %98 = vector.broadcast %cst_25 : f32 to vector<8x32xf32>
    %99 = arith.addf %98, %97 : vector<8x32xf32>
    %100 = arith.divf %98, %99 : vector<8x32xf32>
    %101 = vector.extract_strided_slice %91 {offsets = [0, 32], sizes = [8, 32], strides = [1, 1]} : vector<8x96xf32> to vector<8x32xf32>
    %102 = vector.extract_strided_slice %92 {offsets = [0, 32], sizes = [8, 32], strides = [1, 1]} : vector<8x96xf32> to vector<8x32xf32>
    %103 = arith.addf %101, %102 : vector<8x32xf32>
    %104 = arith.negf %103 : vector<8x32xf32>
    %105 = math.exp %104 : vector<8x32xf32>
    %cst_26 = arith.constant 1.000000e+00 : f32
    %106 = vector.broadcast %cst_26 : f32 to vector<8x32xf32>
    %107 = arith.addf %106, %105 : vector<8x32xf32>
    %108 = arith.divf %106, %107 : vector<8x32xf32>
    %109 = vector.extract_strided_slice %91 {offsets = [0, 64], sizes = [8, 32], strides = [1, 1]} : vector<8x96xf32> to vector<8x32xf32>
    %110 = vector.extract_strided_slice %92 {offsets = [0, 64], sizes = [8, 32], strides = [1, 1]} : vector<8x96xf32> to vector<8x32xf32>
    %111 = arith.addf %110, %5 : vector<8x32xf32>
    %112 = arith.mulf %100, %111 : vector<8x32xf32>
    %113 = arith.addf %109, %112 : vector<8x32xf32>
    %114 = math.tanh %113 : vector<8x32xf32>
    %cst_27 = arith.constant 1.000000e+00 : f32
    %115 = vector.broadcast %cst_27 : f32 to vector<8x32xf32>
    %116 = arith.subf %115, %108 : vector<8x32xf32>
    %117 = arith.mulf %116, %114 : vector<8x32xf32>
    %118 = arith.mulf %108, %57 : vector<8x32xf32>
    %119 = arith.addf %117, %118 : vector<8x32xf32>
    %cst_28 = arith.constant dense<0.000000e+00> : vector<8x96xf32>
    %120 = tpu.matmul %119, %7, %cst_28 {dimension_numbers = #tpu.dot_dimension_numbers<[1], [0], [0], [1], [0, 0, 1, 1], [], []>} : vector<8x32xf32>, vector<32x96xf32>, vector<8x96xf32> -> vector<8x96xf32>
    %121 = arith.addf %120, %11 : vector<8x96xf32>
    %cst_29 = arith.constant dense<0.000000e+00> : vector<8x96xf32>
    %122 = tpu.matmul %87, %8, %cst_29 {dimension_numbers = #tpu.dot_dimension_numbers<[1], [0], [0], [1], [0, 0, 1, 1], [], []>} : vector<8x32xf32>, vector<32x96xf32>, vector<8x96xf32> -> vector<8x96xf32>
    %123 = vector.extract_strided_slice %121 {offsets = [0, 0], sizes = [8, 32], strides = [1, 1]} : vector<8x96xf32> to vector<8x32xf32>
    %124 = vector.extract_strided_slice %122 {offsets = [0, 0], sizes = [8, 32], strides = [1, 1]} : vector<8x96xf32> to vector<8x32xf32>
    %125 = arith.addf %123, %124 : vector<8x32xf32>
    %126 = arith.negf %125 : vector<8x32xf32>
    %127 = math.exp %126 : vector<8x32xf32>
    %cst_30 = arith.constant 1.000000e+00 : f32
    %128 = vector.broadcast %cst_30 : f32 to vector<8x32xf32>
    %129 = arith.addf %128, %127 : vector<8x32xf32>
    %130 = arith.divf %128, %129 : vector<8x32xf32>
    %131 = vector.extract_strided_slice %121 {offsets = [0, 32], sizes = [8, 32], strides = [1, 1]} : vector<8x96xf32> to vector<8x32xf32>
    %132 = vector.extract_strided_slice %122 {offsets = [0, 32], sizes = [8, 32], strides = [1, 1]} : vector<8x96xf32> to vector<8x32xf32>
    %133 = arith.addf %131, %132 : vector<8x32xf32>
    %134 = arith.negf %133 : vector<8x32xf32>
    %135 = math.exp %134 : vector<8x32xf32>
    %cst_31 = arith.constant 1.000000e+00 : f32
    %136 = vector.broadcast %cst_31 : f32 to vector<8x32xf32>
    %137 = arith.addf %136, %135 : vector<8x32xf32>
    %138 = arith.divf %136, %137 : vector<8x32xf32>
    %139 = vector.extract_strided_slice %121 {offsets = [0, 64], sizes = [8, 32], strides = [1, 1]} : vector<8x96xf32> to vector<8x32xf32>
    %140 = vector.extract_strided_slice %122 {offsets = [0, 64], sizes = [8, 32], strides = [1, 1]} : vector<8x96xf32> to vector<8x32xf32>
    %141 = arith.addf %140, %14 : vector<8x32xf32>
    %142 = arith.mulf %130, %141 : vector<8x32xf32>
    %143 = arith.addf %139, %142 : vector<8x32xf32>
    %144 = math.tanh %143 : vector<8x32xf32>
    %cst_32 = arith.constant 1.000000e+00 : f32
    %145 = vector.broadcast %cst_32 : f32 to vector<8x32xf32>
    %146 = arith.subf %145, %138 : vector<8x32xf32>
    %147 = arith.mulf %146, %144 : vector<8x32xf32>
    %148 = arith.mulf %138, %87 : vector<8x32xf32>
    %149 = arith.addf %147, %148 : vector<8x32xf32>
    %150 = vector.extract_strided_slice %21 {offsets = [32, 0], sizes = [32, 4], strides = [1, 1]} : vector<257x4xf32> to vector<32x4xf32>
    %cst_33 = arith.constant dense<0.000000e+00> : vector<8x4xf32>
    %151 = tpu.matmul %149, %150, %cst_33 {dimension_numbers = #tpu.dot_dimension_numbers<[1], [0], [0], [1], [0, 0, 1, 1], [], []>} : vector<8x32xf32>, vector<32x4xf32>, vector<8x4xf32> -> vector<8x4xf32>
    %152 = arith.addf %90, %151 : vector<8x4xf32>
    %153 = vector.extract_strided_slice %20 {offsets = [16, 0], sizes = [8, 96], strides = [1, 1]} : vector<64x96xf32> to vector<8x96xf32>
    %cst_34 = arith.constant dense<0.000000e+00> : vector<8x96xf32>
    %154 = tpu.matmul %119, %2, %cst_34 {dimension_numbers = #tpu.dot_dimension_numbers<[1], [0], [0], [1], [0, 0, 1, 1], [], []>} : vector<8x32xf32>, vector<32x96xf32>, vector<8x96xf32> -> vector<8x96xf32>
    %155 = vector.extract_strided_slice %153 {offsets = [0, 0], sizes = [8, 32], strides = [1, 1]} : vector<8x96xf32> to vector<8x32xf32>
    %156 = vector.extract_strided_slice %154 {offsets = [0, 0], sizes = [8, 32], strides = [1, 1]} : vector<8x96xf32> to vector<8x32xf32>
    %157 = arith.addf %155, %156 : vector<8x32xf32>
    %158 = arith.negf %157 : vector<8x32xf32>
    %159 = math.exp %158 : vector<8x32xf32>
    %cst_35 = arith.constant 1.000000e+00 : f32
    %160 = vector.broadcast %cst_35 : f32 to vector<8x32xf32>
    %161 = arith.addf %160, %159 : vector<8x32xf32>
    %162 = arith.divf %160, %161 : vector<8x32xf32>
    %163 = vector.extract_strided_slice %153 {offsets = [0, 32], sizes = [8, 32], strides = [1, 1]} : vector<8x96xf32> to vector<8x32xf32>
    %164 = vector.extract_strided_slice %154 {offsets = [0, 32], sizes = [8, 32], strides = [1, 1]} : vector<8x96xf32> to vector<8x32xf32>
    %165 = arith.addf %163, %164 : vector<8x32xf32>
    %166 = arith.negf %165 : vector<8x32xf32>
    %167 = math.exp %166 : vector<8x32xf32>
    %cst_36 = arith.constant 1.000000e+00 : f32
    %168 = vector.broadcast %cst_36 : f32 to vector<8x32xf32>
    %169 = arith.addf %168, %167 : vector<8x32xf32>
    %170 = arith.divf %168, %169 : vector<8x32xf32>
    %171 = vector.extract_strided_slice %153 {offsets = [0, 64], sizes = [8, 32], strides = [1, 1]} : vector<8x96xf32> to vector<8x32xf32>
    %172 = vector.extract_strided_slice %154 {offsets = [0, 64], sizes = [8, 32], strides = [1, 1]} : vector<8x96xf32> to vector<8x32xf32>
    %173 = arith.addf %172, %5 : vector<8x32xf32>
    %174 = arith.mulf %162, %173 : vector<8x32xf32>
    %175 = arith.addf %171, %174 : vector<8x32xf32>
    %176 = math.tanh %175 : vector<8x32xf32>
    %cst_37 = arith.constant 1.000000e+00 : f32
    %177 = vector.broadcast %cst_37 : f32 to vector<8x32xf32>
    %178 = arith.subf %177, %170 : vector<8x32xf32>
    %179 = arith.mulf %178, %176 : vector<8x32xf32>
    %180 = arith.mulf %170, %119 : vector<8x32xf32>
    %181 = arith.addf %179, %180 : vector<8x32xf32>
    %cst_38 = arith.constant dense<0.000000e+00> : vector<8x96xf32>
    %182 = tpu.matmul %181, %7, %cst_38 {dimension_numbers = #tpu.dot_dimension_numbers<[1], [0], [0], [1], [0, 0, 1, 1], [], []>} : vector<8x32xf32>, vector<32x96xf32>, vector<8x96xf32> -> vector<8x96xf32>
    %183 = arith.addf %182, %11 : vector<8x96xf32>
    %cst_39 = arith.constant dense<0.000000e+00> : vector<8x96xf32>
    %184 = tpu.matmul %149, %8, %cst_39 {dimension_numbers = #tpu.dot_dimension_numbers<[1], [0], [0], [1], [0, 0, 1, 1], [], []>} : vector<8x32xf32>, vector<32x96xf32>, vector<8x96xf32> -> vector<8x96xf32>
    %185 = vector.extract_strided_slice %183 {offsets = [0, 0], sizes = [8, 32], strides = [1, 1]} : vector<8x96xf32> to vector<8x32xf32>
    %186 = vector.extract_strided_slice %184 {offsets = [0, 0], sizes = [8, 32], strides = [1, 1]} : vector<8x96xf32> to vector<8x32xf32>
    %187 = arith.addf %185, %186 : vector<8x32xf32>
    %188 = arith.negf %187 : vector<8x32xf32>
    %189 = math.exp %188 : vector<8x32xf32>
    %cst_40 = arith.constant 1.000000e+00 : f32
    %190 = vector.broadcast %cst_40 : f32 to vector<8x32xf32>
    %191 = arith.addf %190, %189 : vector<8x32xf32>
    %192 = arith.divf %190, %191 : vector<8x32xf32>
    %193 = vector.extract_strided_slice %183 {offsets = [0, 32], sizes = [8, 32], strides = [1, 1]} : vector<8x96xf32> to vector<8x32xf32>
    %194 = vector.extract_strided_slice %184 {offsets = [0, 32], sizes = [8, 32], strides = [1, 1]} : vector<8x96xf32> to vector<8x32xf32>
    %195 = arith.addf %193, %194 : vector<8x32xf32>
    %196 = arith.negf %195 : vector<8x32xf32>
    %197 = math.exp %196 : vector<8x32xf32>
    %cst_41 = arith.constant 1.000000e+00 : f32
    %198 = vector.broadcast %cst_41 : f32 to vector<8x32xf32>
    %199 = arith.addf %198, %197 : vector<8x32xf32>
    %200 = arith.divf %198, %199 : vector<8x32xf32>
    %201 = vector.extract_strided_slice %183 {offsets = [0, 64], sizes = [8, 32], strides = [1, 1]} : vector<8x96xf32> to vector<8x32xf32>
    %202 = vector.extract_strided_slice %184 {offsets = [0, 64], sizes = [8, 32], strides = [1, 1]} : vector<8x96xf32> to vector<8x32xf32>
    %203 = arith.addf %202, %14 : vector<8x32xf32>
    %204 = arith.mulf %192, %203 : vector<8x32xf32>
    %205 = arith.addf %201, %204 : vector<8x32xf32>
    %206 = math.tanh %205 : vector<8x32xf32>
    %cst_42 = arith.constant 1.000000e+00 : f32
    %207 = vector.broadcast %cst_42 : f32 to vector<8x32xf32>
    %208 = arith.subf %207, %200 : vector<8x32xf32>
    %209 = arith.mulf %208, %206 : vector<8x32xf32>
    %210 = arith.mulf %200, %149 : vector<8x32xf32>
    %211 = arith.addf %209, %210 : vector<8x32xf32>
    %212 = vector.extract_strided_slice %21 {offsets = [64, 0], sizes = [32, 4], strides = [1, 1]} : vector<257x4xf32> to vector<32x4xf32>
    %cst_43 = arith.constant dense<0.000000e+00> : vector<8x4xf32>
    %213 = tpu.matmul %211, %212, %cst_43 {dimension_numbers = #tpu.dot_dimension_numbers<[1], [0], [0], [1], [0, 0, 1, 1], [], []>} : vector<8x32xf32>, vector<32x4xf32>, vector<8x4xf32> -> vector<8x4xf32>
    %214 = arith.addf %152, %213 : vector<8x4xf32>
    %215 = vector.extract_strided_slice %20 {offsets = [24, 0], sizes = [8, 96], strides = [1, 1]} : vector<64x96xf32> to vector<8x96xf32>
    %cst_44 = arith.constant dense<0.000000e+00> : vector<8x96xf32>
    %216 = tpu.matmul %181, %2, %cst_44 {dimension_numbers = #tpu.dot_dimension_numbers<[1], [0], [0], [1], [0, 0, 1, 1], [], []>} : vector<8x32xf32>, vector<32x96xf32>, vector<8x96xf32> -> vector<8x96xf32>
    %217 = vector.extract_strided_slice %215 {offsets = [0, 0], sizes = [8, 32], strides = [1, 1]} : vector<8x96xf32> to vector<8x32xf32>
    %218 = vector.extract_strided_slice %216 {offsets = [0, 0], sizes = [8, 32], strides = [1, 1]} : vector<8x96xf32> to vector<8x32xf32>
    %219 = arith.addf %217, %218 : vector<8x32xf32>
    %220 = arith.negf %219 : vector<8x32xf32>
    %221 = math.exp %220 : vector<8x32xf32>
    %cst_45 = arith.constant 1.000000e+00 : f32
    %222 = vector.broadcast %cst_45 : f32 to vector<8x32xf32>
    %223 = arith.addf %222, %221 : vector<8x32xf32>
    %224 = arith.divf %222, %223 : vector<8x32xf32>
    %225 = vector.extract_strided_slice %215 {offsets = [0, 32], sizes = [8, 32], strides = [1, 1]} : vector<8x96xf32> to vector<8x32xf32>
    %226 = vector.extract_strided_slice %216 {offsets = [0, 32], sizes = [8, 32], strides = [1, 1]} : vector<8x96xf32> to vector<8x32xf32>
    %227 = arith.addf %225, %226 : vector<8x32xf32>
    %228 = arith.negf %227 : vector<8x32xf32>
    %229 = math.exp %228 : vector<8x32xf32>
    %cst_46 = arith.constant 1.000000e+00 : f32
    %230 = vector.broadcast %cst_46 : f32 to vector<8x32xf32>
    %231 = arith.addf %230, %229 : vector<8x32xf32>
    %232 = arith.divf %230, %231 : vector<8x32xf32>
    %233 = vector.extract_strided_slice %215 {offsets = [0, 64], sizes = [8, 32], strides = [1, 1]} : vector<8x96xf32> to vector<8x32xf32>
    %234 = vector.extract_strided_slice %216 {offsets = [0, 64], sizes = [8, 32], strides = [1, 1]} : vector<8x96xf32> to vector<8x32xf32>
    %235 = arith.addf %234, %5 : vector<8x32xf32>
    %236 = arith.mulf %224, %235 : vector<8x32xf32>
    %237 = arith.addf %233, %236 : vector<8x32xf32>
    %238 = math.tanh %237 : vector<8x32xf32>
    %cst_47 = arith.constant 1.000000e+00 : f32
    %239 = vector.broadcast %cst_47 : f32 to vector<8x32xf32>
    %240 = arith.subf %239, %232 : vector<8x32xf32>
    %241 = arith.mulf %240, %238 : vector<8x32xf32>
    %242 = arith.mulf %232, %181 : vector<8x32xf32>
    %243 = arith.addf %241, %242 : vector<8x32xf32>
    %cst_48 = arith.constant dense<0.000000e+00> : vector<8x96xf32>
    %244 = tpu.matmul %243, %7, %cst_48 {dimension_numbers = #tpu.dot_dimension_numbers<[1], [0], [0], [1], [0, 0, 1, 1], [], []>} : vector<8x32xf32>, vector<32x96xf32>, vector<8x96xf32> -> vector<8x96xf32>
    %245 = arith.addf %244, %11 : vector<8x96xf32>
    %cst_49 = arith.constant dense<0.000000e+00> : vector<8x96xf32>
    %246 = tpu.matmul %211, %8, %cst_49 {dimension_numbers = #tpu.dot_dimension_numbers<[1], [0], [0], [1], [0, 0, 1, 1], [], []>} : vector<8x32xf32>, vector<32x96xf32>, vector<8x96xf32> -> vector<8x96xf32>
    %247 = vector.extract_strided_slice %245 {offsets = [0, 0], sizes = [8, 32], strides = [1, 1]} : vector<8x96xf32> to vector<8x32xf32>
    %248 = vector.extract_strided_slice %246 {offsets = [0, 0], sizes = [8, 32], strides = [1, 1]} : vector<8x96xf32> to vector<8x32xf32>
    %249 = arith.addf %247, %248 : vector<8x32xf32>
    %250 = arith.negf %249 : vector<8x32xf32>
    %251 = math.exp %250 : vector<8x32xf32>
    %cst_50 = arith.constant 1.000000e+00 : f32
    %252 = vector.broadcast %cst_50 : f32 to vector<8x32xf32>
    %253 = arith.addf %252, %251 : vector<8x32xf32>
    %254 = arith.divf %252, %253 : vector<8x32xf32>
    %255 = vector.extract_strided_slice %245 {offsets = [0, 32], sizes = [8, 32], strides = [1, 1]} : vector<8x96xf32> to vector<8x32xf32>
    %256 = vector.extract_strided_slice %246 {offsets = [0, 32], sizes = [8, 32], strides = [1, 1]} : vector<8x96xf32> to vector<8x32xf32>
    %257 = arith.addf %255, %256 : vector<8x32xf32>
    %258 = arith.negf %257 : vector<8x32xf32>
    %259 = math.exp %258 : vector<8x32xf32>
    %cst_51 = arith.constant 1.000000e+00 : f32
    %260 = vector.broadcast %cst_51 : f32 to vector<8x32xf32>
    %261 = arith.addf %260, %259 : vector<8x32xf32>
    %262 = arith.divf %260, %261 : vector<8x32xf32>
    %263 = vector.extract_strided_slice %245 {offsets = [0, 64], sizes = [8, 32], strides = [1, 1]} : vector<8x96xf32> to vector<8x32xf32>
    %264 = vector.extract_strided_slice %246 {offsets = [0, 64], sizes = [8, 32], strides = [1, 1]} : vector<8x96xf32> to vector<8x32xf32>
    %265 = arith.addf %264, %14 : vector<8x32xf32>
    %266 = arith.mulf %254, %265 : vector<8x32xf32>
    %267 = arith.addf %263, %266 : vector<8x32xf32>
    %268 = math.tanh %267 : vector<8x32xf32>
    %cst_52 = arith.constant 1.000000e+00 : f32
    %269 = vector.broadcast %cst_52 : f32 to vector<8x32xf32>
    %270 = arith.subf %269, %262 : vector<8x32xf32>
    %271 = arith.mulf %270, %268 : vector<8x32xf32>
    %272 = arith.mulf %262, %211 : vector<8x32xf32>
    %273 = arith.addf %271, %272 : vector<8x32xf32>
    %274 = vector.extract_strided_slice %21 {offsets = [96, 0], sizes = [32, 4], strides = [1, 1]} : vector<257x4xf32> to vector<32x4xf32>
    %cst_53 = arith.constant dense<0.000000e+00> : vector<8x4xf32>
    %275 = tpu.matmul %273, %274, %cst_53 {dimension_numbers = #tpu.dot_dimension_numbers<[1], [0], [0], [1], [0, 0, 1, 1], [], []>} : vector<8x32xf32>, vector<32x4xf32>, vector<8x4xf32> -> vector<8x4xf32>
    %276 = arith.addf %214, %275 : vector<8x4xf32>
    %277 = vector.extract_strided_slice %20 {offsets = [32, 0], sizes = [8, 96], strides = [1, 1]} : vector<64x96xf32> to vector<8x96xf32>
    %cst_54 = arith.constant dense<0.000000e+00> : vector<8x96xf32>
    %278 = tpu.matmul %243, %2, %cst_54 {dimension_numbers = #tpu.dot_dimension_numbers<[1], [0], [0], [1], [0, 0, 1, 1], [], []>} : vector<8x32xf32>, vector<32x96xf32>, vector<8x96xf32> -> vector<8x96xf32>
    %279 = vector.extract_strided_slice %277 {offsets = [0, 0], sizes = [8, 32], strides = [1, 1]} : vector<8x96xf32> to vector<8x32xf32>
    %280 = vector.extract_strided_slice %278 {offsets = [0, 0], sizes = [8, 32], strides = [1, 1]} : vector<8x96xf32> to vector<8x32xf32>
    %281 = arith.addf %279, %280 : vector<8x32xf32>
    %282 = arith.negf %281 : vector<8x32xf32>
    %283 = math.exp %282 : vector<8x32xf32>
    %cst_55 = arith.constant 1.000000e+00 : f32
    %284 = vector.broadcast %cst_55 : f32 to vector<8x32xf32>
    %285 = arith.addf %284, %283 : vector<8x32xf32>
    %286 = arith.divf %284, %285 : vector<8x32xf32>
    %287 = vector.extract_strided_slice %277 {offsets = [0, 32], sizes = [8, 32], strides = [1, 1]} : vector<8x96xf32> to vector<8x32xf32>
    %288 = vector.extract_strided_slice %278 {offsets = [0, 32], sizes = [8, 32], strides = [1, 1]} : vector<8x96xf32> to vector<8x32xf32>
    %289 = arith.addf %287, %288 : vector<8x32xf32>
    %290 = arith.negf %289 : vector<8x32xf32>
    %291 = math.exp %290 : vector<8x32xf32>
    %cst_56 = arith.constant 1.000000e+00 : f32
    %292 = vector.broadcast %cst_56 : f32 to vector<8x32xf32>
    %293 = arith.addf %292, %291 : vector<8x32xf32>
    %294 = arith.divf %292, %293 : vector<8x32xf32>
    %295 = vector.extract_strided_slice %277 {offsets = [0, 64], sizes = [8, 32], strides = [1, 1]} : vector<8x96xf32> to vector<8x32xf32>
    %296 = vector.extract_strided_slice %278 {offsets = [0, 64], sizes = [8, 32], strides = [1, 1]} : vector<8x96xf32> to vector<8x32xf32>
    %297 = arith.addf %296, %5 : vector<8x32xf32>
    %298 = arith.mulf %286, %297 : vector<8x32xf32>
    %299 = arith.addf %295, %298 : vector<8x32xf32>
    %300 = math.tanh %299 : vector<8x32xf32>
    %cst_57 = arith.constant 1.000000e+00 : f32
    %301 = vector.broadcast %cst_57 : f32 to vector<8x32xf32>
    %302 = arith.subf %301, %294 : vector<8x32xf32>
    %303 = arith.mulf %302, %300 : vector<8x32xf32>
    %304 = arith.mulf %294, %243 : vector<8x32xf32>
    %305 = arith.addf %303, %304 : vector<8x32xf32>
    %cst_58 = arith.constant dense<0.000000e+00> : vector<8x96xf32>
    %306 = tpu.matmul %305, %7, %cst_58 {dimension_numbers = #tpu.dot_dimension_numbers<[1], [0], [0], [1], [0, 0, 1, 1], [], []>} : vector<8x32xf32>, vector<32x96xf32>, vector<8x96xf32> -> vector<8x96xf32>
    %307 = arith.addf %306, %11 : vector<8x96xf32>
    %cst_59 = arith.constant dense<0.000000e+00> : vector<8x96xf32>
    %308 = tpu.matmul %273, %8, %cst_59 {dimension_numbers = #tpu.dot_dimension_numbers<[1], [0], [0], [1], [0, 0, 1, 1], [], []>} : vector<8x32xf32>, vector<32x96xf32>, vector<8x96xf32> -> vector<8x96xf32>
    %309 = vector.extract_strided_slice %307 {offsets = [0, 0], sizes = [8, 32], strides = [1, 1]} : vector<8x96xf32> to vector<8x32xf32>
    %310 = vector.extract_strided_slice %308 {offsets = [0, 0], sizes = [8, 32], strides = [1, 1]} : vector<8x96xf32> to vector<8x32xf32>
    %311 = arith.addf %309, %310 : vector<8x32xf32>
    %312 = arith.negf %311 : vector<8x32xf32>
    %313 = math.exp %312 : vector<8x32xf32>
    %cst_60 = arith.constant 1.000000e+00 : f32
    %314 = vector.broadcast %cst_60 : f32 to vector<8x32xf32>
    %315 = arith.addf %314, %313 : vector<8x32xf32>
    %316 = arith.divf %314, %315 : vector<8x32xf32>
    %317 = vector.extract_strided_slice %307 {offsets = [0, 32], sizes = [8, 32], strides = [1, 1]} : vector<8x96xf32> to vector<8x32xf32>
    %318 = vector.extract_strided_slice %308 {offsets = [0, 32], sizes = [8, 32], strides = [1, 1]} : vector<8x96xf32> to vector<8x32xf32>
    %319 = arith.addf %317, %318 : vector<8x32xf32>
    %320 = arith.negf %319 : vector<8x32xf32>
    %321 = math.exp %320 : vector<8x32xf32>
    %cst_61 = arith.constant 1.000000e+00 : f32
    %322 = vector.broadcast %cst_61 : f32 to vector<8x32xf32>
    %323 = arith.addf %322, %321 : vector<8x32xf32>
    %324 = arith.divf %322, %323 : vector<8x32xf32>
    %325 = vector.extract_strided_slice %307 {offsets = [0, 64], sizes = [8, 32], strides = [1, 1]} : vector<8x96xf32> to vector<8x32xf32>
    %326 = vector.extract_strided_slice %308 {offsets = [0, 64], sizes = [8, 32], strides = [1, 1]} : vector<8x96xf32> to vector<8x32xf32>
    %327 = arith.addf %326, %14 : vector<8x32xf32>
    %328 = arith.mulf %316, %327 : vector<8x32xf32>
    %329 = arith.addf %325, %328 : vector<8x32xf32>
    %330 = math.tanh %329 : vector<8x32xf32>
    %cst_62 = arith.constant 1.000000e+00 : f32
    %331 = vector.broadcast %cst_62 : f32 to vector<8x32xf32>
    %332 = arith.subf %331, %324 : vector<8x32xf32>
    %333 = arith.mulf %332, %330 : vector<8x32xf32>
    %334 = arith.mulf %324, %273 : vector<8x32xf32>
    %335 = arith.addf %333, %334 : vector<8x32xf32>
    %336 = vector.extract_strided_slice %21 {offsets = [128, 0], sizes = [32, 4], strides = [1, 1]} : vector<257x4xf32> to vector<32x4xf32>
    %cst_63 = arith.constant dense<0.000000e+00> : vector<8x4xf32>
    %337 = tpu.matmul %335, %336, %cst_63 {dimension_numbers = #tpu.dot_dimension_numbers<[1], [0], [0], [1], [0, 0, 1, 1], [], []>} : vector<8x32xf32>, vector<32x4xf32>, vector<8x4xf32> -> vector<8x4xf32>
    %338 = arith.addf %276, %337 : vector<8x4xf32>
    %339 = vector.extract_strided_slice %20 {offsets = [40, 0], sizes = [8, 96], strides = [1, 1]} : vector<64x96xf32> to vector<8x96xf32>
    %cst_64 = arith.constant dense<0.000000e+00> : vector<8x96xf32>
    %340 = tpu.matmul %305, %2, %cst_64 {dimension_numbers = #tpu.dot_dimension_numbers<[1], [0], [0], [1], [0, 0, 1, 1], [], []>} : vector<8x32xf32>, vector<32x96xf32>, vector<8x96xf32> -> vector<8x96xf32>
    %341 = vector.extract_strided_slice %339 {offsets = [0, 0], sizes = [8, 32], strides = [1, 1]} : vector<8x96xf32> to vector<8x32xf32>
    %342 = vector.extract_strided_slice %340 {offsets = [0, 0], sizes = [8, 32], strides = [1, 1]} : vector<8x96xf32> to vector<8x32xf32>
    %343 = arith.addf %341, %342 : vector<8x32xf32>
    %344 = arith.negf %343 : vector<8x32xf32>
    %345 = math.exp %344 : vector<8x32xf32>
    %cst_65 = arith.constant 1.000000e+00 : f32
    %346 = vector.broadcast %cst_65 : f32 to vector<8x32xf32>
    %347 = arith.addf %346, %345 : vector<8x32xf32>
    %348 = arith.divf %346, %347 : vector<8x32xf32>
    %349 = vector.extract_strided_slice %339 {offsets = [0, 32], sizes = [8, 32], strides = [1, 1]} : vector<8x96xf32> to vector<8x32xf32>
    %350 = vector.extract_strided_slice %340 {offsets = [0, 32], sizes = [8, 32], strides = [1, 1]} : vector<8x96xf32> to vector<8x32xf32>
    %351 = arith.addf %349, %350 : vector<8x32xf32>
    %352 = arith.negf %351 : vector<8x32xf32>
    %353 = math.exp %352 : vector<8x32xf32>
    %cst_66 = arith.constant 1.000000e+00 : f32
    %354 = vector.broadcast %cst_66 : f32 to vector<8x32xf32>
    %355 = arith.addf %354, %353 : vector<8x32xf32>
    %356 = arith.divf %354, %355 : vector<8x32xf32>
    %357 = vector.extract_strided_slice %339 {offsets = [0, 64], sizes = [8, 32], strides = [1, 1]} : vector<8x96xf32> to vector<8x32xf32>
    %358 = vector.extract_strided_slice %340 {offsets = [0, 64], sizes = [8, 32], strides = [1, 1]} : vector<8x96xf32> to vector<8x32xf32>
    %359 = arith.addf %358, %5 : vector<8x32xf32>
    %360 = arith.mulf %348, %359 : vector<8x32xf32>
    %361 = arith.addf %357, %360 : vector<8x32xf32>
    %362 = math.tanh %361 : vector<8x32xf32>
    %cst_67 = arith.constant 1.000000e+00 : f32
    %363 = vector.broadcast %cst_67 : f32 to vector<8x32xf32>
    %364 = arith.subf %363, %356 : vector<8x32xf32>
    %365 = arith.mulf %364, %362 : vector<8x32xf32>
    %366 = arith.mulf %356, %305 : vector<8x32xf32>
    %367 = arith.addf %365, %366 : vector<8x32xf32>
    %cst_68 = arith.constant dense<0.000000e+00> : vector<8x96xf32>
    %368 = tpu.matmul %367, %7, %cst_68 {dimension_numbers = #tpu.dot_dimension_numbers<[1], [0], [0], [1], [0, 0, 1, 1], [], []>} : vector<8x32xf32>, vector<32x96xf32>, vector<8x96xf32> -> vector<8x96xf32>
    %369 = arith.addf %368, %11 : vector<8x96xf32>
    %cst_69 = arith.constant dense<0.000000e+00> : vector<8x96xf32>
    %370 = tpu.matmul %335, %8, %cst_69 {dimension_numbers = #tpu.dot_dimension_numbers<[1], [0], [0], [1], [0, 0, 1, 1], [], []>} : vector<8x32xf32>, vector<32x96xf32>, vector<8x96xf32> -> vector<8x96xf32>
    %371 = vector.extract_strided_slice %369 {offsets = [0, 0], sizes = [8, 32], strides = [1, 1]} : vector<8x96xf32> to vector<8x32xf32>
    %372 = vector.extract_strided_slice %370 {offsets = [0, 0], sizes = [8, 32], strides = [1, 1]} : vector<8x96xf32> to vector<8x32xf32>
    %373 = arith.addf %371, %372 : vector<8x32xf32>
    %374 = arith.negf %373 : vector<8x32xf32>
    %375 = math.exp %374 : vector<8x32xf32>
    %cst_70 = arith.constant 1.000000e+00 : f32
    %376 = vector.broadcast %cst_70 : f32 to vector<8x32xf32>
    %377 = arith.addf %376, %375 : vector<8x32xf32>
    %378 = arith.divf %376, %377 : vector<8x32xf32>
    %379 = vector.extract_strided_slice %369 {offsets = [0, 32], sizes = [8, 32], strides = [1, 1]} : vector<8x96xf32> to vector<8x32xf32>
    %380 = vector.extract_strided_slice %370 {offsets = [0, 32], sizes = [8, 32], strides = [1, 1]} : vector<8x96xf32> to vector<8x32xf32>
    %381 = arith.addf %379, %380 : vector<8x32xf32>
    %382 = arith.negf %381 : vector<8x32xf32>
    %383 = math.exp %382 : vector<8x32xf32>
    %cst_71 = arith.constant 1.000000e+00 : f32
    %384 = vector.broadcast %cst_71 : f32 to vector<8x32xf32>
    %385 = arith.addf %384, %383 : vector<8x32xf32>
    %386 = arith.divf %384, %385 : vector<8x32xf32>
    %387 = vector.extract_strided_slice %369 {offsets = [0, 64], sizes = [8, 32], strides = [1, 1]} : vector<8x96xf32> to vector<8x32xf32>
    %388 = vector.extract_strided_slice %370 {offsets = [0, 64], sizes = [8, 32], strides = [1, 1]} : vector<8x96xf32> to vector<8x32xf32>
    %389 = arith.addf %388, %14 : vector<8x32xf32>
    %390 = arith.mulf %378, %389 : vector<8x32xf32>
    %391 = arith.addf %387, %390 : vector<8x32xf32>
    %392 = math.tanh %391 : vector<8x32xf32>
    %cst_72 = arith.constant 1.000000e+00 : f32
    %393 = vector.broadcast %cst_72 : f32 to vector<8x32xf32>
    %394 = arith.subf %393, %386 : vector<8x32xf32>
    %395 = arith.mulf %394, %392 : vector<8x32xf32>
    %396 = arith.mulf %386, %335 : vector<8x32xf32>
    %397 = arith.addf %395, %396 : vector<8x32xf32>
    %398 = vector.extract_strided_slice %21 {offsets = [160, 0], sizes = [32, 4], strides = [1, 1]} : vector<257x4xf32> to vector<32x4xf32>
    %cst_73 = arith.constant dense<0.000000e+00> : vector<8x4xf32>
    %399 = tpu.matmul %397, %398, %cst_73 {dimension_numbers = #tpu.dot_dimension_numbers<[1], [0], [0], [1], [0, 0, 1, 1], [], []>} : vector<8x32xf32>, vector<32x4xf32>, vector<8x4xf32> -> vector<8x4xf32>
    %400 = arith.addf %338, %399 : vector<8x4xf32>
    %401 = vector.extract_strided_slice %20 {offsets = [48, 0], sizes = [8, 96], strides = [1, 1]} : vector<64x96xf32> to vector<8x96xf32>
    %cst_74 = arith.constant dense<0.000000e+00> : vector<8x96xf32>
    %402 = tpu.matmul %367, %2, %cst_74 {dimension_numbers = #tpu.dot_dimension_numbers<[1], [0], [0], [1], [0, 0, 1, 1], [], []>} : vector<8x32xf32>, vector<32x96xf32>, vector<8x96xf32> -> vector<8x96xf32>
    %403 = vector.extract_strided_slice %401 {offsets = [0, 0], sizes = [8, 32], strides = [1, 1]} : vector<8x96xf32> to vector<8x32xf32>
    %404 = vector.extract_strided_slice %402 {offsets = [0, 0], sizes = [8, 32], strides = [1, 1]} : vector<8x96xf32> to vector<8x32xf32>
    %405 = arith.addf %403, %404 : vector<8x32xf32>
    %406 = arith.negf %405 : vector<8x32xf32>
    %407 = math.exp %406 : vector<8x32xf32>
    %cst_75 = arith.constant 1.000000e+00 : f32
    %408 = vector.broadcast %cst_75 : f32 to vector<8x32xf32>
    %409 = arith.addf %408, %407 : vector<8x32xf32>
    %410 = arith.divf %408, %409 : vector<8x32xf32>
    %411 = vector.extract_strided_slice %401 {offsets = [0, 32], sizes = [8, 32], strides = [1, 1]} : vector<8x96xf32> to vector<8x32xf32>
    %412 = vector.extract_strided_slice %402 {offsets = [0, 32], sizes = [8, 32], strides = [1, 1]} : vector<8x96xf32> to vector<8x32xf32>
    %413 = arith.addf %411, %412 : vector<8x32xf32>
    %414 = arith.negf %413 : vector<8x32xf32>
    %415 = math.exp %414 : vector<8x32xf32>
    %cst_76 = arith.constant 1.000000e+00 : f32
    %416 = vector.broadcast %cst_76 : f32 to vector<8x32xf32>
    %417 = arith.addf %416, %415 : vector<8x32xf32>
    %418 = arith.divf %416, %417 : vector<8x32xf32>
    %419 = vector.extract_strided_slice %401 {offsets = [0, 64], sizes = [8, 32], strides = [1, 1]} : vector<8x96xf32> to vector<8x32xf32>
    %420 = vector.extract_strided_slice %402 {offsets = [0, 64], sizes = [8, 32], strides = [1, 1]} : vector<8x96xf32> to vector<8x32xf32>
    %421 = arith.addf %420, %5 : vector<8x32xf32>
    %422 = arith.mulf %410, %421 : vector<8x32xf32>
    %423 = arith.addf %419, %422 : vector<8x32xf32>
    %424 = math.tanh %423 : vector<8x32xf32>
    %cst_77 = arith.constant 1.000000e+00 : f32
    %425 = vector.broadcast %cst_77 : f32 to vector<8x32xf32>
    %426 = arith.subf %425, %418 : vector<8x32xf32>
    %427 = arith.mulf %426, %424 : vector<8x32xf32>
    %428 = arith.mulf %418, %367 : vector<8x32xf32>
    %429 = arith.addf %427, %428 : vector<8x32xf32>
    %cst_78 = arith.constant dense<0.000000e+00> : vector<8x96xf32>
    %430 = tpu.matmul %429, %7, %cst_78 {dimension_numbers = #tpu.dot_dimension_numbers<[1], [0], [0], [1], [0, 0, 1, 1], [], []>} : vector<8x32xf32>, vector<32x96xf32>, vector<8x96xf32> -> vector<8x96xf32>
    %431 = arith.addf %430, %11 : vector<8x96xf32>
    %cst_79 = arith.constant dense<0.000000e+00> : vector<8x96xf32>
    %432 = tpu.matmul %397, %8, %cst_79 {dimension_numbers = #tpu.dot_dimension_numbers<[1], [0], [0], [1], [0, 0, 1, 1], [], []>} : vector<8x32xf32>, vector<32x96xf32>, vector<8x96xf32> -> vector<8x96xf32>
    %433 = vector.extract_strided_slice %431 {offsets = [0, 0], sizes = [8, 32], strides = [1, 1]} : vector<8x96xf32> to vector<8x32xf32>
    %434 = vector.extract_strided_slice %432 {offsets = [0, 0], sizes = [8, 32], strides = [1, 1]} : vector<8x96xf32> to vector<8x32xf32>
    %435 = arith.addf %433, %434 : vector<8x32xf32>
    %436 = arith.negf %435 : vector<8x32xf32>
    %437 = math.exp %436 : vector<8x32xf32>
    %cst_80 = arith.constant 1.000000e+00 : f32
    %438 = vector.broadcast %cst_80 : f32 to vector<8x32xf32>
    %439 = arith.addf %438, %437 : vector<8x32xf32>
    %440 = arith.divf %438, %439 : vector<8x32xf32>
    %441 = vector.extract_strided_slice %431 {offsets = [0, 32], sizes = [8, 32], strides = [1, 1]} : vector<8x96xf32> to vector<8x32xf32>
    %442 = vector.extract_strided_slice %432 {offsets = [0, 32], sizes = [8, 32], strides = [1, 1]} : vector<8x96xf32> to vector<8x32xf32>
    %443 = arith.addf %441, %442 : vector<8x32xf32>
    %444 = arith.negf %443 : vector<8x32xf32>
    %445 = math.exp %444 : vector<8x32xf32>
    %cst_81 = arith.constant 1.000000e+00 : f32
    %446 = vector.broadcast %cst_81 : f32 to vector<8x32xf32>
    %447 = arith.addf %446, %445 : vector<8x32xf32>
    %448 = arith.divf %446, %447 : vector<8x32xf32>
    %449 = vector.extract_strided_slice %431 {offsets = [0, 64], sizes = [8, 32], strides = [1, 1]} : vector<8x96xf32> to vector<8x32xf32>
    %450 = vector.extract_strided_slice %432 {offsets = [0, 64], sizes = [8, 32], strides = [1, 1]} : vector<8x96xf32> to vector<8x32xf32>
    %451 = arith.addf %450, %14 : vector<8x32xf32>
    %452 = arith.mulf %440, %451 : vector<8x32xf32>
    %453 = arith.addf %449, %452 : vector<8x32xf32>
    %454 = math.tanh %453 : vector<8x32xf32>
    %cst_82 = arith.constant 1.000000e+00 : f32
    %455 = vector.broadcast %cst_82 : f32 to vector<8x32xf32>
    %456 = arith.subf %455, %448 : vector<8x32xf32>
    %457 = arith.mulf %456, %454 : vector<8x32xf32>
    %458 = arith.mulf %448, %397 : vector<8x32xf32>
    %459 = arith.addf %457, %458 : vector<8x32xf32>
    %460 = vector.extract_strided_slice %21 {offsets = [192, 0], sizes = [32, 4], strides = [1, 1]} : vector<257x4xf32> to vector<32x4xf32>
    %cst_83 = arith.constant dense<0.000000e+00> : vector<8x4xf32>
    %461 = tpu.matmul %459, %460, %cst_83 {dimension_numbers = #tpu.dot_dimension_numbers<[1], [0], [0], [1], [0, 0, 1, 1], [], []>} : vector<8x32xf32>, vector<32x4xf32>, vector<8x4xf32> -> vector<8x4xf32>
    %462 = arith.addf %400, %461 : vector<8x4xf32>
    %463 = vector.extract_strided_slice %20 {offsets = [56, 0], sizes = [8, 96], strides = [1, 1]} : vector<64x96xf32> to vector<8x96xf32>
    %cst_84 = arith.constant dense<0.000000e+00> : vector<8x96xf32>
    %464 = tpu.matmul %429, %2, %cst_84 {dimension_numbers = #tpu.dot_dimension_numbers<[1], [0], [0], [1], [0, 0, 1, 1], [], []>} : vector<8x32xf32>, vector<32x96xf32>, vector<8x96xf32> -> vector<8x96xf32>
    %465 = vector.extract_strided_slice %463 {offsets = [0, 0], sizes = [8, 32], strides = [1, 1]} : vector<8x96xf32> to vector<8x32xf32>
    %466 = vector.extract_strided_slice %464 {offsets = [0, 0], sizes = [8, 32], strides = [1, 1]} : vector<8x96xf32> to vector<8x32xf32>
    %467 = arith.addf %465, %466 : vector<8x32xf32>
    %468 = arith.negf %467 : vector<8x32xf32>
    %469 = math.exp %468 : vector<8x32xf32>
    %cst_85 = arith.constant 1.000000e+00 : f32
    %470 = vector.broadcast %cst_85 : f32 to vector<8x32xf32>
    %471 = arith.addf %470, %469 : vector<8x32xf32>
    %472 = arith.divf %470, %471 : vector<8x32xf32>
    %473 = vector.extract_strided_slice %463 {offsets = [0, 32], sizes = [8, 32], strides = [1, 1]} : vector<8x96xf32> to vector<8x32xf32>
    %474 = vector.extract_strided_slice %464 {offsets = [0, 32], sizes = [8, 32], strides = [1, 1]} : vector<8x96xf32> to vector<8x32xf32>
    %475 = arith.addf %473, %474 : vector<8x32xf32>
    %476 = arith.negf %475 : vector<8x32xf32>
    %477 = math.exp %476 : vector<8x32xf32>
    %cst_86 = arith.constant 1.000000e+00 : f32
    %478 = vector.broadcast %cst_86 : f32 to vector<8x32xf32>
    %479 = arith.addf %478, %477 : vector<8x32xf32>
    %480 = arith.divf %478, %479 : vector<8x32xf32>
    %481 = vector.extract_strided_slice %463 {offsets = [0, 64], sizes = [8, 32], strides = [1, 1]} : vector<8x96xf32> to vector<8x32xf32>
    %482 = vector.extract_strided_slice %464 {offsets = [0, 64], sizes = [8, 32], strides = [1, 1]} : vector<8x96xf32> to vector<8x32xf32>
    %483 = arith.addf %482, %5 : vector<8x32xf32>
    %484 = arith.mulf %472, %483 : vector<8x32xf32>
    %485 = arith.addf %481, %484 : vector<8x32xf32>
    %486 = math.tanh %485 : vector<8x32xf32>
    %cst_87 = arith.constant 1.000000e+00 : f32
    %487 = vector.broadcast %cst_87 : f32 to vector<8x32xf32>
    %488 = arith.subf %487, %480 : vector<8x32xf32>
    %489 = arith.mulf %488, %486 : vector<8x32xf32>
    %490 = arith.mulf %480, %429 : vector<8x32xf32>
    %491 = arith.addf %489, %490 : vector<8x32xf32>
    %cst_88 = arith.constant dense<0.000000e+00> : vector<8x96xf32>
    %492 = tpu.matmul %491, %7, %cst_88 {dimension_numbers = #tpu.dot_dimension_numbers<[1], [0], [0], [1], [0, 0, 1, 1], [], []>} : vector<8x32xf32>, vector<32x96xf32>, vector<8x96xf32> -> vector<8x96xf32>
    %493 = arith.addf %492, %11 : vector<8x96xf32>
    %cst_89 = arith.constant dense<0.000000e+00> : vector<8x96xf32>
    %494 = tpu.matmul %459, %8, %cst_89 {dimension_numbers = #tpu.dot_dimension_numbers<[1], [0], [0], [1], [0, 0, 1, 1], [], []>} : vector<8x32xf32>, vector<32x96xf32>, vector<8x96xf32> -> vector<8x96xf32>
    %495 = vector.extract_strided_slice %493 {offsets = [0, 0], sizes = [8, 32], strides = [1, 1]} : vector<8x96xf32> to vector<8x32xf32>
    %496 = vector.extract_strided_slice %494 {offsets = [0, 0], sizes = [8, 32], strides = [1, 1]} : vector<8x96xf32> to vector<8x32xf32>
    %497 = arith.addf %495, %496 : vector<8x32xf32>
    %498 = arith.negf %497 : vector<8x32xf32>
    %499 = math.exp %498 : vector<8x32xf32>
    %cst_90 = arith.constant 1.000000e+00 : f32
    %500 = vector.broadcast %cst_90 : f32 to vector<8x32xf32>
    %501 = arith.addf %500, %499 : vector<8x32xf32>
    %502 = arith.divf %500, %501 : vector<8x32xf32>
    %503 = vector.extract_strided_slice %493 {offsets = [0, 32], sizes = [8, 32], strides = [1, 1]} : vector<8x96xf32> to vector<8x32xf32>
    %504 = vector.extract_strided_slice %494 {offsets = [0, 32], sizes = [8, 32], strides = [1, 1]} : vector<8x96xf32> to vector<8x32xf32>
    %505 = arith.addf %503, %504 : vector<8x32xf32>
    %506 = arith.negf %505 : vector<8x32xf32>
    %507 = math.exp %506 : vector<8x32xf32>
    %cst_91 = arith.constant 1.000000e+00 : f32
    %508 = vector.broadcast %cst_91 : f32 to vector<8x32xf32>
    %509 = arith.addf %508, %507 : vector<8x32xf32>
    %510 = arith.divf %508, %509 : vector<8x32xf32>
    %511 = vector.extract_strided_slice %493 {offsets = [0, 64], sizes = [8, 32], strides = [1, 1]} : vector<8x96xf32> to vector<8x32xf32>
    %512 = vector.extract_strided_slice %494 {offsets = [0, 64], sizes = [8, 32], strides = [1, 1]} : vector<8x96xf32> to vector<8x32xf32>
    %513 = arith.addf %512, %14 : vector<8x32xf32>
    %514 = arith.mulf %502, %513 : vector<8x32xf32>
    %515 = arith.addf %511, %514 : vector<8x32xf32>
    %516 = math.tanh %515 : vector<8x32xf32>
    %cst_92 = arith.constant 1.000000e+00 : f32
    %517 = vector.broadcast %cst_92 : f32 to vector<8x32xf32>
    %518 = arith.subf %517, %510 : vector<8x32xf32>
    %519 = arith.mulf %518, %516 : vector<8x32xf32>
    %520 = arith.mulf %510, %459 : vector<8x32xf32>
    %521 = arith.addf %519, %520 : vector<8x32xf32>
    %522 = vector.extract_strided_slice %21 {offsets = [224, 0], sizes = [32, 4], strides = [1, 1]} : vector<257x4xf32> to vector<32x4xf32>
    %cst_93 = arith.constant dense<0.000000e+00> : vector<8x4xf32>
    %523 = tpu.matmul %521, %522, %cst_93 {dimension_numbers = #tpu.dot_dimension_numbers<[1], [0], [0], [1], [0, 0, 1, 1], [], []>} : vector<8x32xf32>, vector<32x4xf32>, vector<8x4xf32> -> vector<8x4xf32>
    %524 = arith.addf %462, %523 : vector<8x4xf32>
    %c0_94 = arith.constant 0 : index
    %c0_95 = arith.constant 0 : index
    %525 = vector.load %arg5[%c0_94, %c0_95] : memref<8x4xf32, #tpu.memory_space<vmem>>, vector<8x4xf32>
    tpu.vector_store %arg5[%c0_94, %c0_95], %524 {strides = array<i32>} : memref<8x4xf32, #tpu.memory_space<vmem>>, vector<8x4xf32>,
    return
  }
}

</mosaic_0001>

<bundles_post_ra>
// kernel: rnn_forward.1
= control target key start
LH: loop header
LB: loop body
LE: loop exit
PB: predicated region body
PF: predicated region fallthrough
CT: control target
= control target key end

     0   :  { %v3929_v0 = vmov 0.0|0.0   ;;  %vm3930_vm0 = vmmov 0   ;;  %v3931_v4 = vmov 0.0   ;;  %vm62_vm1 = vcmask 261120   ;;  %s3932_s17 = smov 64   ;;  %s3933_s18 = smov 96   ;;  %s4578_s2 = inlined_call_operand.vmem [shape: f32[66,96], index: 2, kind: input, shape index: {}]   ;;  %s4579_s0 = inlined_call_operand.vmem [shape: f32[64,32], index: 0, kind: input, shape index: {}]   ;;  %s4580_s1 = inlined_call_operand.vmem [shape: f32[2,8,32], index: 1, kind: input, shape index: {}]   ;;  %s4581_s3 = inlined_call_operand.vmem [shape: f32[66,96], index: 3, kind: input, shape index: {}]   ;;  %s4582_s4 = inlined_call_operand.vmem [shape: f32[257,4], index: 4, kind: input, shape index: {}]   ;;  %s4583_s5 = inlined_call_operand.vmem [shape: f32[8,4], index: 5, kind: output, shape index: {}]  }
   0x1   :  { %3620 = vmatprep.subr.bf16.mxu1 %v3929_v0  ;;  %v20_v1 = vld [vmem:[%s4578_s2] sm:$0xff]  ;;  %v21_v2 = vld [vmem:[%s4578_s2 + $0x8] sm:$0xff]  ;;  %3268 = vmatprep.mubr.msk.f32.mxu1 %vm3930_vm0, %v3931_v4  ;;  %v22_v7 = vld [vmem:[%s4578_s2 + $0x10] sm:$0xff]  ;;  %v29_v17 = vlaneseq  ;;  %s3934_s21 = smov 32   ;;  %vm3004_vm2 = vcmask 31744  }
   0x2   :  { %v24_v3 = vld [vmem:[%s4578_s2 + $0x20] sm:$0xff]  ;;  %v3612_v5 = vpack.c.bf16 %v21_v2, %v20_v1  ;;  %v25_v6 = vld [vmem:[%s4578_s2 + $0x28] sm:$0xff]  ;;  %v23_v8 = vld [vmem:[%s4578_s2 + $0x18] sm:$0xff] }
   0x3   :  { %v3986_v9 = vpack.c.bf16 %v25_v6, %v24_v3  ;;  %v3616_v10 = vpack.c.bf16 %v23_v8, %v22_v7  ;;  %v26_v11 = vld [vmem:[%s4578_s2 + $0x30] sm:$0xff]  ;;  %v27_v12 = vld [vmem:[%s4578_s2 + $0x38] sm:$0xff]  ;;  %v50_v13 = vld [vmem:[%s4579_s0] sm:$0xff]  ;;  %v4018_v18 = vshrl.u32 %v29_v17, 7 }
   0x4   :  { %3613 = vmatprep.subr.bf16.mxu0 %v3612_v5  ;;  %3248 = vmatprep.mubr.msk.f32.mxu0 %vm62_vm1, %v50_v13  ;;  %v3999_v14 = vpack.c.bf16 %v27_v12, %v26_v11  ;;  %v4006_v15 = vld [vmem:[%s4580_s1] sm:$0xff]  ;;  %v51_v16 = vld [vmem:[%s4579_s0 + $0x8] sm:$0xff]  ;;  %v52_v39 = vld [vmem:[%s4579_s0 + $0x10] sm:$0xff] }
   0x5   :  { %3622 = vmatpush3.bf16.msra.mxu1 %v3986_v9  ;;  %3615 = vmatpush3.bf16.msra.mxu0 %v3612_v5  ;;  %v31_v19 = vsub.s32 1, %v4018_v18  ;;  %v28_v20 = vld [vmem:[%s4578_s2 + $0x40] sm:$0x3]  ;;  %v44_v27 = vsub.s32 0, %v4018_v18  ;;  %v53_v40 = vld [vmem:[%s4579_s0 + $0x18] sm:$0xff]  ;;  %v38_v43 = vld [vmem:[%s4581_s3 + $0x28] sm:$0xff] }
   0x6   :  { %3623 = vmatprep.subr.bf16.mxu1 %v3929_v0  ;;  %3617 = vmatprep.subr.bf16.mxu0 %v3616_v10  ;;  %v54_v41 = vld [vmem:[%s4579_s0 + $0x20] sm:$0xff]  ;;  %v39_v45 = vld [vmem:[%s4581_s3 + $0x30] sm:$0xff]  ;;  %v40_v46 = vld [vmem:[%s4581_s3 + $0x38] sm:$0xff] }
   0x7   :  { %v4026_v21 = vrot.slane %v28_v20, %v31_v19  ;;  %v4035_v28 = vrot.slane %v28_v20, %v44_v27  ;;  %v37_v42 = vld [vmem:[%s4581_s3 + $0x20] sm:$0xff]  ;;  %v55_v47 = vld [vmem:[%s4579_s0 + $0x28] sm:$0xff]  ;;  %v4075_v51 = vpack.c.bf16 %v40_v46, %v39_v45  ;;  %v56_v52 = vld [vmem:[%s4579_s0 + $0x30] sm:$0xff] }
   0x8   :  { %v4055_v44 = vpack.c.bf16 %v38_v43, %v37_v42  ;;  %v33_v48 = vld [vmem:[%s4581_s3] sm:$0xff]  ;;  %v34_v49 = vld [vmem:[%s4581_s3 + $0x8] sm:$0xff]  ;;  %v35_v54 = vld [vmem:[%s4581_s3 + $0x10] sm:$0xff] }
   0x9   :  { %3625 = vmatpush3.bf16.msra.mxu1 %v3999_v14  ;;  %3619 = vmatpush3.bf16.msra.mxu0 %v3616_v10  ;;  %v4080_v53 = vpack.c.bf16 %v34_v49, %v33_v48  ;;  %v36_v55 = vld [vmem:[%s4581_s3 + $0x18] sm:$0xff]  ;;  %v4108_v58 = vld [vmem:[%s4580_s1 + $0x8] sm:$0xff]  ;;  %v41_v7 = vld [vmem:[%s4581_s3 + $0x40] sm:$0x3] }
   0xa   :  { %3632 = vmatprep.subr.bf16.mxu0 %v3929_v0  ;;  %3626 = vmatprep.subr.bf16.mxu1 %v3929_v0  ;;  %v4092_v56 = vpack.c.bf16 %v36_v55, %v35_v54  ;;  %v57_v57 = vld [vmem:[%s4579_s0 + $0x38] sm:$0xff]  ;;  %v4142_v11 = vrot.slane %v41_v7, %v31_v19  ;;  %v4158_v17 = vrot.slane %v41_v7, %v44_v27  ;;  %v193_v48 = vld [vmem:[%s4582_s4 + $0x8] sm:$0xff]  ;;  %v194_v49 = vld [vmem:[%s4582_s4 + $0x10] sm:$0xff] }
   0xc   :  { %3269 = vmatmul.mubr.msk.f32.vlgmr.msra.gmra.mrb[0].mxu1 %vm62_vm1, %v4006_v15  ;;  %3249 = vmatmul.mubr.msk.f32.vlgmr.msra.gmra.mrb[0].mxu0 %vm62_vm1, %v51_v16 }
   0xd   :  { %3279 = vmatprep.mubr.msk.f32.mxu1 %vm3930_vm0, %v3931_v4  ;;  %3251 = vmatprep.mubr.msk.f32.mxu0 %vm62_vm1, %v52_v39 }
   0xe   :  { %3634 = vmatpush3.bf16.msra.mxu0 %v4055_v44  ;;  %3628 = vmatpush3.bf16.msra.mxu1 %v4080_v53 }
   0xf   :  { %3635 = vmatprep.subr.bf16.mxu0 %v3929_v0  ;;  %3629 = vmatprep.subr.bf16.mxu1 %v3929_v0 }
  0x10   :  { %3252 = vmatmul.mubr.msk.f32.gmra.mrb[2].mxu0 %vm62_vm1, %v53_v40 }
  0x11   :  { %3254 = vmatprep.mubr.msk.f32.mxu0 %vm62_vm1, %v54_v41 }
  0x12   :  { %3637 = vmatpush3.bf16.msra.mxu0 %v4075_v51  ;;  %3631 = vmatpush3.bf16.msra.mxu1 %v4092_v56 }
  0x13   :  { %3644 = vmatprep.subr.bf16.mxu0 %v3929_v0  ;;  %3638 = vmatprep.subr.bf16.mxu1 %v3929_v0 }
  0x14   :  { %3255 = vmatmul.mubr.msk.f32.gmra.mrb[4].mxu0 %vm62_vm1, %v55_v47  ;;  %v192_v47 = vld [vmem:[%s4582_s4] sm:$0xff] }
  0x15   :  { %3257 = vmatprep.mubr.msk.f32.mxu0 %vm62_vm1, %v56_v52  ;;  %v195_v52 = vld [vmem:[%s4582_s4 + $0x18] sm:$0xff] }
  0x16   :  { %v3642_v54 = vpack.c.bf16 %v195_v52, %v194_v49  ;;  %v198_v52 = vld [vmem:[%s4582_s4 + $0x30] sm:$0xff] }
  0x18   :  { %3258 = vmatmul.mubr.msk.f32.gmra.mrb[6].mxu0 %vm62_vm1, %v57_v57 }
  0x19   :  { %3290 = vmatprep.mubr.msk.f32.mxu0 %vm3930_vm0, %v3931_v4 }
  0x1c   :  { %3291 = vmatmul.mubr.msk.f32.vlgmr.msra.gmra.mrb[8].mxu0 %vm62_vm1, %v4108_v58 }
  0x1d   :  { %3646 = vmatpush3.bf16.msra.mxu0 %v3986_v9  ;;  %3312 = vmatprep.mubr.msk.f32.mxu0 %vm3930_vm0, %v3931_v4 }
  0x1e   :  { %3647 = vmatprep.subr.bf16.mxu0 %v3929_v0 }
  0x21   :  { %3649 = vmatpush3.bf16.msra.mxu0 %v3999_v14 }
  0x22   :  { %3656 = vmatprep.subr.bf16.mxu0 %v3929_v0 }
  0xdf   :  { %v301_v22 = vpop.f32.mrb[0].mxu1  ;;  %v4028_v23 = vpop.f32.mrb[0].mxu0 }
  0xe0   :  { %v3270_v24 = vpop.f32.mrb[1].mxu1  ;;  %v153_v25 = vpop.f32.mrb[1].mxu0  ;;  %v312_v26 = vadd.f32 %v301_v22, %v4026_v21 }
  0xe1   :  { %v154_v29 = vadd.f32 %v153_v25, %v4035_v28 }
  0xe2   :  { %314 = vrot.lane.b32.xlu0 %v312_v26, %s3932_s17 }
  0xe3   :  { %v305_v30 = vadd.f32 %v301_v22, %v154_v29  ;;  %v4125_v2 = vpop.f32.mrb[2].mxu0 }
  0xe4   :  { %v4127_v3 = vpop.f32.mrb[3].mxu0 }
  0xe5   :  { %v3021_v31 = vmul.f32 -1.442695, %v305_v30 }
  0xe7   :  { %3833 = vpow2.f32 %v3021_v31  ;;  %v4129_v5 = vpop.f32.mrb[4].mxu0 }
  0xe8   :  { %v4131_v6 = vpop.f32.mrb[5].mxu0 }
  0xeb   :  { %v4136_v8 = vpop.f32.mrb[6].mxu0 }
  0xec   :  { %v4138_v10 = vpop.f32.mrb[7].mxu0 }
  0xef   :  { %v479_v12 = vpop.f32.mrb[8].mxu0 }
  0xf0   :  { %v490_v13 = vadd.f32 %v479_v12, %v4142_v11 }
  0xf1   :  { %v3834_v32 = vpop.eup %3833 }
  0xf2   :  { %v309_v33 = vadd.f32 1.0, %v3834_v32 }
  0xf4   :  { %3835 = vrcp.f32 %v309_v33 }
  0xfe   :  { %v3836_v34 = vpop.eup %3835 }
  0xff   :  { %v324_v60 = vsub.f32 1.0, %v3836_v34 }
 0x154   :  { %v315_v35 = vpop.permute.xlu0 %314 }
 0x155   :  { %v317_v36 = vmul.f32 %v3836_v34, %v315_v35 }
 0x157   :  { %319 = vrot.lane.b32.xlu0 %v317_v36, %s3932_s17 }
 0x1c9   :  { %v320_v37 = vpop.permute.xlu0 %319 }
 0x1ca   :  { %v322_v38 = vadd.f32 %v320_v37, %v154_v29 }
 0x1cc   :  { %3837 = vtanh.f32 %v322_v38 }
 0x1d6   :  { %v3838_v50 = vpop.eup %3837 }
 0x1d7   :  { %326 = vrot.lane.b32.xlu1 %v3838_v50, %s3933_s18  ;;  %v3639_v50 = vpack.c.bf16 %v193_v48, %v192_v47 }
 0x1db   :  { %330 = vrot.lane.b32.xlu1 %v4006_v15, %s3934_s21  ;;  %v3292_v15 = vpop.f32.mrb[9].mxu0 }
 0x1df   :  { %492 = vrot.lane.b32.xlu1 %v490_v13, %s3932_s17 }
 0x249   :  { %v327_v59 = vpop.permute.xlu1 %326 }
 0x24a   :  { %v329_v62 = vmul.f32 %v327_v59, %v324_v60 }
 0x24d   :  { %v331_v61 = vpop.permute.xlu1 %330 }
 0x24e   :  { %v333_v63 = vmul.f32 %v3836_v34, %v331_v61  ;;  %v159_v34 = vadd.f32 %v4028_v23, %v4035_v28 }
 0x250   :  { %v4121_v1 = vadd.f32 %v333_v63, %v329_v62 }
 0x251   :  { %v493_v33 = vpop.permute.xlu1 %492 }
 0x252   :  { %336 = vrot.lane.b32.xlu0 %v4121_v1, %s3933_s18 }
 0x2c4   :  { %v337_v16 = vpop.permute.xlu0 %336 }
 0x2c5   :  { %3280 = vmatmul.mubr.msk.f32.vlgmr.msra.gmra.mrb[2].mxu1 %vm62_vm1, %v337_v16  ;;  %3313 = vmatmul.mubr.msk.f32.vlgmr.msra.gmra.mrb[10].mxu0 %vm62_vm1, %v337_v16 }
 0x2c6   :  { %3658 = vmatpush3.bf16.msra.mxu0 %v4055_v44  ;;  %3301 = vmatprep.mubr.msk.f32.mxu1 %vm3930_vm0, %v3931_v4 }
 0x2c7   :  { %3659 = vmatprep.subr.bf16.mxu0 %v3929_v0  ;;  %3334 = vmatprep.mubr.msk.f32.mxu0 %vm3930_vm0, %v3931_v4 }
 0x2c8   :  { %3640 = vmatpush3.bf16.msra.mxu1 %v3639_v50  ;;  %v197_v50 = vld [vmem:[%s4582_s4 + $0x28] sm:$0xff] }
 0x2c9   :  { %3641 = vmatprep.subr.bf16.mxu1 %v3929_v0 }
 0x2ca   :  { %3661 = vmatpush3.bf16.msra.mxu0 %v4075_v51 }
 0x2cb   :  { %3668 = vmatprep.subr.bf16.mxu0 %v3929_v0 }
 0x2cc   :  { %3643 = vmatpush3.bf16.msra.mxu1 %v3642_v54 }
 0x2cd   :  { %3650 = vmatprep.subr.bf16.mxu1 %v3929_v0 }
 0x398   :  { %v406_v19 = vpop.f32.mrb[2].mxu1  ;;  %v655_v20 = vpop.f32.mrb[10].mxu0 }
 0x399   :  { %v407_v22 = vadd.f32 %v406_v19, %v4158_v17  ;;  %v666_v24 = vadd.f32 %v655_v20, %v4026_v21  ;;  %v3281_v25 = vpop.f32.mrb[3].mxu1  ;;  %v3314_v26 = vpop.f32.mrb[11].mxu0  ;;  %v659_v35 = vadd.f32 %v655_v20, %v159_v34 }
 0x39b   :  { %v483_v29 = vadd.f32 %v479_v12, %v407_v22  ;;  %668 = vrot.lane.b32.xlu0 %v666_v24, %s3932_s17  ;;  %v3027_v36 = vmul.f32 -1.442695, %v659_v35 }
 0x39d   :  { %v3024_v30 = vmul.f32 -1.442695, %v483_v29 }
 0x39f   :  { %3839 = vpow2.f32 %v3024_v30 }
 0x3a9   :  { %v3840_v31 = vpop.eup %3839 }
 0x3aa   :  { %v487_v32 = vadd.f32 1.0, %v3840_v31 }
 0x3ac   :  { %3841 = vrcp.f32 %v487_v32 }
 0x3ad   :  { %3843 = vpow2.f32 %v3027_v36 }
 0x3b6   :  { %v3842_v18 = vpop.eup %3841 }
 0x3b7   :  { %v495_v27 = vmul.f32 %v3842_v18, %v493_v33  ;;  %v3844_v37 = vpop.eup %3843 }
 0x3b8   :  { %v663_v38 = vadd.f32 1.0, %v3844_v37  ;;  %v164_v37 = vadd.f32 %v4127_v3, %v4035_v28  ;;  %v196_v3 = vld [vmem:[%s4582_s4 + $0x20] sm:$0xff] }
 0x3b9   :  { %497 = vrot.lane.b32.xlu1 %v495_v27, %s3932_s17  ;;  %v3663_v54 = vpack.c.bf16 %v197_v50, %v196_v3  ;;  %v201_v50 = vld [vmem:[%s4582_s4 + $0x48] sm:$0xff] }
 0x3ba   :  { %3845 = vrcp.f32 %v663_v38 }
 0x3c4   :  { %v3846_v39 = vpop.eup %3845 }
 0x3c5   :  { %v678_v63 = vsub.f32 1.0, %v3846_v39  ;;  %v684_v12 = vmul.f32 %v3846_v39, %v4121_v1 }
 0x40d   :  { %v669_v40 = vpop.permute.xlu0 %668 }
 0x40e   :  { %v671_v41 = vmul.f32 %v3846_v39, %v669_v40 }
 0x410   :  { %673 = vrot.lane.b32.xlu0 %v671_v41, %s3932_s17 }
 0x414   :  { %508 = vrot.lane.b32.xlu0 %v4108_v58, %s3934_s21  ;;  %v502_v58 = vsub.f32 1.0, %v3842_v18 }
 0x42b   :  { %v498_v42 = vpop.permute.xlu1 %497 }
 0x42c   :  { %v500_v43 = vadd.f32 %v498_v42, %v407_v22 }
 0x42e   :  { %3847 = vtanh.f32 %v500_v43 }
 0x438   :  { %v3848_v45 = vpop.eup %3847 }
 0x439   :  { %504 = vrot.lane.b32.xlu1 %v3848_v45, %s3933_s18 }
 0x482   :  { %v674_v23 = vpop.permute.xlu0 %673 }
 0x483   :  { %v676_v46 = vadd.f32 %v674_v23, %v159_v34 }
 0x485   :  { %3849 = vtanh.f32 %v676_v46 }
 0x486   :  { %v509_v57 = vpop.permute.xlu0 %508 }
 0x487   :  { %v511_v60 = vmul.f32 %v3842_v18, %v509_v57 }
 0x48f   :  { %v3850_v55 = vpop.eup %3849 }
 0x490   :  { %680 = vrot.lane.b32.xlu1 %v3850_v55, %s3933_s18  ;;  %v199_v55 = vld [vmem:[%s4582_s4 + $0x38] sm:$0xff] }
 0x491   :  { %v3666_v57 = vpack.c.bf16 %v199_v55, %v198_v52  ;;  %v202_v52 = vld [vmem:[%s4582_s4 + $0x50] sm:$0xff]  ;;  %v203_v55 = vld [vmem:[%s4582_s4 + $0x58] sm:$0xff] }
 0x4ab   :  { %v505_v59 = vpop.permute.xlu1 %504 }
 0x4ac   :  { %v507_v61 = vmul.f32 %v505_v59, %v502_v58 }
 0x4ae   :  { %v4185_v62 = vadd.f32 %v511_v60, %v507_v61 }
 0x4b0   :  { %514 = vrot.lane.b32.xlu0 %v4185_v62, %s3933_s18 }
 0x502   :  { %v681_v7 = vpop.permute.xlu1 %680 }
 0x503   :  { %v683_v13 = vmul.f32 %v681_v7, %v678_v63 }
 0x505   :  { %v4190_v15 = vadd.f32 %v684_v12, %v683_v13 }
 0x507   :  { %687 = vrot.lane.b32.xlu1 %v4190_v15, %s3933_s18 }
 0x522   :  { %v515_v16 = vpop.permute.xlu0 %514 }
 0x523   :  { %3302 = vmatmul.mubr.msk.f32.vlgmr.msra.gmra.mrb[4].mxu1 %vm62_vm1, %v515_v16  ;;  %3335 = vmatmul.mubr.msk.f32.vlgmr.msra.gmra.mrb[12].mxu0 %vm62_vm1, %v515_v16 }
 0x524   :  { %3652 = vmatpush3.bf16.msra.mxu1 %v4080_v53  ;;  %3670 = vmatpush3.bf16.msra.mxu0 %v3986_v9 }
 0x525   :  { %3653 = vmatprep.subr.bf16.mxu1 %v3929_v0  ;;  %3671 = vmatprep.subr.bf16.mxu0 %v3929_v0 }
 0x526   :  { %3323 = vmatprep.mubr.msk.f32.mxu1 %vm3930_vm0, %v3931_v4  ;;  %3356 = vmatprep.mubr.msk.f32.mxu0 %vm3930_vm0, %v3931_v4 }
 0x528   :  { %3655 = vmatpush3.bf16.msra.mxu1 %v4092_v56  ;;  %3673 = vmatpush3.bf16.msra.mxu0 %v3999_v14 }
 0x529   :  { %3662 = vmatprep.subr.bf16.mxu1 %v3929_v0  ;;  %3680 = vmatprep.subr.bf16.mxu0 %v3929_v0 }
 0x579   :  { %v688_v1 = vpop.permute.xlu1 %687 }
 0x57a   :  { %3324 = vmatmul.mubr.msk.f32.vlgmr.msra.gmra.mrb[6].mxu1 %vm62_vm1, %v688_v1  ;;  %3357 = vmatmul.mubr.msk.f32.vlgmr.msra.gmra.mrb[14].mxu0 %vm62_vm1, %v688_v1 }
 0x57b   :  { %3682 = vmatpush3.bf16.msra.mxu0 %v4055_v44  ;;  %3345 = vmatprep.mubr.msk.f32.mxu1 %vm3930_vm0, %v3931_v4 }
 0x57c   :  { %3683 = vmatprep.subr.bf16.mxu0 %v3929_v0  ;;  %3378 = vmatprep.mubr.msk.f32.mxu0 %vm3930_vm0, %v3931_v4 }
 0x57d   :  { %3664 = vmatpush3.bf16.msra.mxu1 %v3663_v54 }
 0x57e   :  { %3665 = vmatprep.subr.bf16.mxu1 %v3929_v0 }
 0x57f   :  { %3685 = vmatpush3.bf16.msra.mxu0 %v4075_v51 }
 0x580   :  { %3692 = vmatprep.subr.bf16.mxu0 %v3929_v0 }
 0x581   :  { %3667 = vmatpush3.bf16.msra.mxu1 %v3666_v57  ;;  %v3690_v57 = vpack.c.bf16 %v203_v55, %v202_v52 }
 0x582   :  { %3674 = vmatprep.subr.bf16.mxu1 %v3929_v0 }
 0x5f6   :  { %v827_v19 = vpop.f32.mrb[12].mxu0 }
 0x5f7   :  { %v838_v20 = vadd.f32 %v827_v19, %v4142_v11  ;;  %v3336_v22 = vpop.f32.mrb[13].mxu0 }
 0x5f9   :  { %840 = vrot.lane.b32.xlu0 %v838_v20, %s3932_s17 }
 0x64d   :  { %v757_v24 = vpop.f32.mrb[6].mxu1  ;;  %v1000_v25 = vpop.f32.mrb[14].mxu0 }
 0x64e   :  { %v758_v26 = vadd.f32 %v757_v24, %v4158_v17  ;;  %v1011_v29 = vadd.f32 %v1000_v25, %v4026_v21  ;;  %v3325_v30 = vpop.f32.mrb[7].mxu1  ;;  %v3358_v31 = vpop.f32.mrb[15].mxu0  ;;  %v1004_v38 = vadd.f32 %v1000_v25, %v164_v37 }
 0x650   :  { %v831_v32 = vadd.f32 %v827_v19, %v758_v26  ;;  %1013 = vrot.lane.b32.xlu1 %v1011_v29, %s3932_s17  ;;  %v3033_v39 = vmul.f32 -1.442695, %v1004_v38  ;;  %v169_v38 = vadd.f32 %v4125_v2, %v4035_v28  ;;  %v200_v2 = vld [vmem:[%s4582_s4 + $0x40] sm:$0xff] }
 0x651   :  { %v3687_v54 = vpack.c.bf16 %v201_v50, %v200_v2  ;;  %v205_v2 = vld [vmem:[%s4582_s4 + $0x68] sm:$0xff]  ;;  %v206_v50 = vld [vmem:[%s4582_s4 + $0x70] sm:$0xff] }
 0x652   :  { %v3030_v33 = vmul.f32 -1.442695, %v831_v32 }
 0x654   :  { %3851 = vpow2.f32 %v3030_v33 }
 0x65e   :  { %v3852_v18 = vpop.eup %3851 }
 0x65f   :  { %v835_v27 = vadd.f32 1.0, %v3852_v18 }
 0x661   :  { %3853 = vrcp.f32 %v835_v27 }
 0x662   :  { %3855 = vpow2.f32 %v3033_v39 }
 0x66b   :  { %v3854_v34 = vpop.eup %3853  ;;  %v841_v35 = vpop.permute.xlu0 %840 }
 0x66c   :  { %v843_v36 = vmul.f32 %v3854_v34, %v841_v35  ;;  %v3856_v40 = vpop.eup %3855  ;;  %v850_v59 = vsub.f32 1.0, %v3854_v34  ;;  %v856_v61 = vmul.f32 %v3854_v34, %v4185_v62 }
 0x66d   :  { %v1008_v41 = vadd.f32 1.0, %v3856_v40 }
 0x66e   :  { %845 = vrot.lane.b32.xlu0 %v843_v36, %s3932_s17 }
 0x66f   :  { %3857 = vrcp.f32 %v1008_v41 }
 0x679   :  { %v3858_v42 = vpop.eup %3857 }
 0x67a   :  { %v1023_v12 = vsub.f32 1.0, %v3858_v42  ;;  %v1029_v16 = vmul.f32 %v3858_v42, %v4190_v15 }
 0x6c2   :  { %v1014_v43 = vpop.permute.xlu1 %1013 }
 0x6c3   :  { %v1016_v45 = vmul.f32 %v3858_v42, %v1014_v43 }
 0x6c5   :  { %1018 = vrot.lane.b32.xlu1 %v1016_v45, %s3932_s17 }
 0x6e0   :  { %v846_v23 = vpop.permute.xlu0 %845 }
 0x6e1   :  { %v848_v46 = vadd.f32 %v846_v23, %v758_v26 }
 0x6e3   :  { %3859 = vtanh.f32 %v848_v46 }
 0x6ed   :  { %v3860_v47 = vpop.eup %3859 }
 0x6ee   :  { %852 = vrot.lane.b32.xlu0 %v3860_v47, %s3933_s18 }
 0x737   :  { %v1019_v48 = vpop.permute.xlu1 %1018 }
 0x738   :  { %v1021_v49 = vadd.f32 %v1019_v48, %v164_v37 }
 0x73a   :  { %3861 = vtanh.f32 %v1021_v49 }
 0x744   :  { %v3862_v58 = vpop.eup %3861 }
 0x745   :  { %1025 = vrot.lane.b32.xlu1 %v3862_v58, %s3933_s18 }
 0x760   :  { %v853_v60 = vpop.permute.xlu0 %852 }
 0x761   :  { %v855_v63 = vmul.f32 %v853_v60, %v850_v59 }
 0x763   :  { %v4244_v7 = vadd.f32 %v856_v61, %v855_v63 }
 0x765   :  { %859 = vrot.lane.b32.xlu0 %v4244_v7, %s3933_s18 }
 0x7b7   :  { %v1026_v13 = vpop.permute.xlu1 %1025 }
 0x7b8   :  { %v1028_v1 = vmul.f32 %v1026_v13, %v1023_v12 }
 0x7ba   :  { %v4249_v19 = vadd.f32 %v1029_v16, %v1028_v1 }
 0x7bc   :  { %1032 = vrot.lane.b32.xlu1 %v4249_v19, %s3933_s18 }
 0x7d7   :  { %v860_v20 = vpop.permute.xlu0 %859 }
 0x7d8   :  { %3346 = vmatmul.mubr.msk.f32.vlgmr.msra.gmra.mrb[4].mxu1 %vm62_vm1, %v860_v20  ;;  %3379 = vmatmul.mubr.msk.f32.vlgmr.msra.gmra.mrb[16].mxu0 %vm62_vm1, %v860_v20 }
 0x7d9   :  { %3676 = vmatpush3.bf16.msra.mxu1 %v4080_v53  ;;  %3694 = vmatpush3.bf16.msra.mxu0 %v3986_v9 }
 0x7da   :  { %3677 = vmatprep.subr.bf16.mxu1 %v3929_v0  ;;  %3695 = vmatprep.subr.bf16.mxu0 %v3929_v0 }
 0x7db   :  { %3367 = vmatprep.mubr.msk.f32.mxu1 %vm3930_vm0, %v3931_v4  ;;  %3400 = vmatprep.mubr.msk.f32.mxu0 %vm3930_vm0, %v3931_v4 }
 0x7dd   :  { %3679 = vmatpush3.bf16.msra.mxu1 %v4092_v56  ;;  %3697 = vmatpush3.bf16.msra.mxu0 %v3999_v14 }
 0x7de   :  { %3686 = vmatprep.subr.bf16.mxu1 %v3929_v0  ;;  %3704 = vmatprep.subr.bf16.mxu0 %v3929_v0 }
 0x82e   :  { %v1033_v62 = vpop.permute.xlu1 %1032 }
 0x82f   :  { %3368 = vmatmul.mubr.msk.f32.vlgmr.msra.gmra.mrb[8].mxu1 %vm62_vm1, %v1033_v62  ;;  %3401 = vmatmul.mubr.msk.f32.vlgmr.msra.gmra.mrb[18].mxu0 %vm62_vm1, %v1033_v62 }
 0x830   :  { %3706 = vmatpush3.bf16.msra.mxu0 %v4055_v44  ;;  %3389 = vmatprep.mubr.msk.f32.mxu1 %vm3930_vm0, %v3931_v4 }
 0x831   :  { %3707 = vmatprep.subr.bf16.mxu0 %v3929_v0  ;;  %3422 = vmatprep.mubr.msk.f32.mxu0 %vm3930_vm0, %v3931_v4 }
 0x832   :  { %3688 = vmatpush3.bf16.msra.mxu1 %v3687_v54  ;;  %v207_v54 = vld [vmem:[%s4582_s4 + $0x78] sm:$0xff] }
 0x833   :  { %3689 = vmatprep.subr.bf16.mxu1 %v3929_v0  ;;  %v3714_v55 = vpack.c.bf16 %v207_v54, %v206_v50  ;;  %v211_v50 = vld [vmem:[%s4582_s4 + $0x98] sm:$0xff] }
 0x834   :  { %3709 = vmatpush3.bf16.msra.mxu0 %v4075_v51 }
 0x835   :  { %3716 = vmatprep.subr.bf16.mxu0 %v3929_v0 }
 0x836   :  { %3691 = vmatpush3.bf16.msra.mxu1 %v3690_v57 }
 0x837   :  { %3698 = vmatprep.subr.bf16.mxu1 %v3929_v0 }
 0x8ab   :  { %v1172_v15 = vpop.f32.mrb[16].mxu0 }
 0x8ac   :  { %v1183_v22 = vadd.f32 %v1172_v15, %v4142_v11  ;;  %v3380_v24 = vpop.f32.mrb[17].mxu0 }
 0x8ae   :  { %1185 = vrot.lane.b32.xlu0 %v1183_v22, %s3932_s17 }
 0x902   :  { %v1102_v25 = vpop.f32.mrb[8].mxu1  ;;  %v1345_v26 = vpop.f32.mrb[18].mxu0 }
 0x903   :  { %v1103_v29 = vadd.f32 %v1102_v25, %v4158_v17  ;;  %v1356_v30 = vadd.f32 %v1345_v26, %v4026_v21  ;;  %v3369_v31 = vpop.f32.mrb[9].mxu1  ;;  %v3402_v32 = vpop.f32.mrb[19].mxu0  ;;  %v1349_v39 = vadd.f32 %v1345_v26, %v169_v38 }
 0x905   :  { %v1176_v33 = vadd.f32 %v1172_v15, %v1103_v29  ;;  %1358 = vrot.lane.b32.xlu1 %v1356_v30, %s3932_s17  ;;  %v3039_v40 = vmul.f32 -1.442695, %v1349_v39 }
 0x907   :  { %v3036_v18 = vmul.f32 -1.442695, %v1176_v33 }
 0x909   :  { %3863 = vpow2.f32 %v3036_v18 }
 0x913   :  { %v3864_v27 = vpop.eup %3863 }
 0x914   :  { %v1180_v34 = vadd.f32 1.0, %v3864_v27 }
 0x916   :  { %3865 = vrcp.f32 %v1180_v34 }
 0x917   :  { %3867 = vpow2.f32 %v3039_v40 }
 0x920   :  { %v3866_v35 = vpop.eup %3865  ;;  %v1186_v36 = vpop.permute.xlu0 %1185 }
 0x921   :  { %v1188_v37 = vmul.f32 %v3866_v35, %v1186_v36  ;;  %v3868_v41 = vpop.eup %3867  ;;  %v1195_v59 = vsub.f32 1.0, %v3866_v35  ;;  %v1201_v61 = vmul.f32 %v3866_v35, %v4244_v7 }
 0x922   :  { %v1353_v42 = vadd.f32 1.0, %v3868_v41 }
 0x923   :  { %1190 = vrot.lane.b32.xlu0 %v1188_v37, %s3932_s17 }
 0x924   :  { %3869 = vrcp.f32 %v1353_v42 }
 0x92e   :  { %v3870_v43 = vpop.eup %3869 }
 0x92f   :  { %v1368_v13 = vsub.f32 1.0, %v3870_v43  ;;  %v1374_v1 = vmul.f32 %v3870_v43, %v4249_v19 }
 0x977   :  { %v1359_v45 = vpop.permute.xlu1 %1358 }
 0x978   :  { %v1361_v23 = vmul.f32 %v3870_v43, %v1359_v45 }
 0x97a   :  { %1363 = vrot.lane.b32.xlu1 %v1361_v23, %s3932_s17 }
 0x995   :  { %v1191_v46 = vpop.permute.xlu0 %1190 }
 0x996   :  { %v1193_v47 = vadd.f32 %v1191_v46, %v1103_v29 }
 0x998   :  { %3871 = vtanh.f32 %v1193_v47 }
 0x9a2   :  { %v3872_v48 = vpop.eup %3871 }
 0x9a3   :  { %1197 = vrot.lane.b32.xlu0 %v3872_v48, %s3933_s18 }
 0x9ec   :  { %v1364_v49 = vpop.permute.xlu1 %1363 }
 0x9ed   :  { %v1366_v3 = vadd.f32 %v1364_v49, %v169_v38  ;;  %v174_v38 = vadd.f32 %v4131_v6, %v4035_v28  ;;  %v204_v6 = vld [vmem:[%s4582_s4 + $0x60] sm:$0xff] }
 0x9ee   :  { %v3711_v52 = vpack.c.bf16 %v205_v2, %v204_v6  ;;  %v210_v6 = vld [vmem:[%s4582_s4 + $0x90] sm:$0xff] }
 0x9ef   :  { %3873 = vtanh.f32 %v1366_v3 }
 0x9f9   :  { %v3874_v58 = vpop.eup %3873 }
 0x9fa   :  { %1370 = vrot.lane.b32.xlu1 %v3874_v58, %s3933_s18 }
 0xa15   :  { %v1198_v60 = vpop.permute.xlu0 %1197 }
 0xa16   :  { %v1200_v63 = vmul.f32 %v1198_v60, %v1195_v59 }
 0xa18   :  { %v4303_v12 = vadd.f32 %v1201_v61, %v1200_v63 }
 0xa1a   :  { %1204 = vrot.lane.b32.xlu0 %v4303_v12, %s3933_s18 }
 0xa6c   :  { %v1371_v16 = vpop.permute.xlu1 %1370 }
 0xa6d   :  { %v1373_v20 = vmul.f32 %v1371_v16, %v1368_v13 }
 0xa6f   :  { %v4308_v62 = vadd.f32 %v1374_v1, %v1373_v20 }
 0xa71   :  { %1377 = vrot.lane.b32.xlu1 %v4308_v62, %s3933_s18 }
 0xa8c   :  { %v1205_v15 = vpop.permute.xlu0 %1204 }
 0xa8d   :  { %3390 = vmatmul.mubr.msk.f32.vlgmr.msra.gmra.mrb[4].mxu1 %vm62_vm1, %v1205_v15  ;;  %3423 = vmatmul.mubr.msk.f32.vlgmr.msra.gmra.mrb[20].mxu0 %vm62_vm1, %v1205_v15 }
 0xa8e   :  { %3700 = vmatpush3.bf16.msra.mxu1 %v4080_v53  ;;  %3718 = vmatpush3.bf16.msra.mxu0 %v3986_v9 }
 0xa8f   :  { %3701 = vmatprep.subr.bf16.mxu1 %v3929_v0  ;;  %3719 = vmatprep.subr.bf16.mxu0 %v3929_v0 }
 0xa90   :  { %3411 = vmatprep.mubr.msk.f32.mxu1 %vm3930_vm0, %v3931_v4  ;;  %3444 = vmatprep.mubr.msk.f32.mxu0 %vm3930_vm0, %v3931_v4 }
 0xa92   :  { %3703 = vmatpush3.bf16.msra.mxu1 %v4092_v56  ;;  %3721 = vmatpush3.bf16.msra.mxu0 %v3999_v14 }
 0xa93   :  { %3710 = vmatprep.subr.bf16.mxu1 %v3929_v0  ;;  %3728 = vmatprep.subr.bf16.mxu0 %v3929_v0 }
 0xae3   :  { %v1378_v7 = vpop.permute.xlu1 %1377 }
 0xae4   :  { %3412 = vmatmul.mubr.msk.f32.vlgmr.msra.gmra.mrb[10].mxu1 %vm62_vm1, %v1378_v7  ;;  %3445 = vmatmul.mubr.msk.f32.vlgmr.msra.gmra.mrb[22].mxu0 %vm62_vm1, %v1378_v7 }
 0xae5   :  { %3730 = vmatpush3.bf16.msra.mxu0 %v4055_v44  ;;  %3433 = vmatprep.mubr.msk.f32.mxu1 %vm3930_vm0, %v3931_v4 }
 0xae6   :  { %3731 = vmatprep.subr.bf16.mxu0 %v3929_v0  ;;  %3466 = vmatprep.mubr.msk.f32.mxu0 %vm3930_vm0, %v3931_v4 }
 0xae7   :  { %3712 = vmatpush3.bf16.msra.mxu1 %v3711_v52  ;;  %v3738_v52 = vpack.c.bf16 %v211_v50, %v210_v6 }
 0xae8   :  { %3713 = vmatprep.subr.bf16.mxu1 %v3929_v0 }
 0xae9   :  { %3733 = vmatpush3.bf16.msra.mxu0 %v4075_v51 }
 0xaea   :  { %3740 = vmatprep.subr.bf16.mxu0 %v3929_v0 }
 0xaeb   :  { %3715 = vmatpush3.bf16.msra.mxu1 %v3714_v55 }
 0xaec   :  { %3722 = vmatprep.subr.bf16.mxu1 %v3929_v0 }
 0xb60   :  { %v1517_v19 = vpop.f32.mrb[20].mxu0 }
 0xb61   :  { %v1528_v22 = vadd.f32 %v1517_v19, %v4142_v11  ;;  %v3424_v24 = vpop.f32.mrb[21].mxu0 }
 0xb63   :  { %1530 = vrot.lane.b32.xlu0 %v1528_v22, %s3932_s17 }
 0xbb7   :  { %v1447_v25 = vpop.f32.mrb[10].mxu1  ;;  %v1690_v26 = vpop.f32.mrb[22].mxu0 }
 0xbb8   :  { %v1448_v29 = vadd.f32 %v1447_v25, %v4158_v17  ;;  %v1701_v30 = vadd.f32 %v1690_v26, %v4026_v21  ;;  %v3413_v31 = vpop.f32.mrb[11].mxu1  ;;  %v3446_v32 = vpop.f32.mrb[23].mxu0  ;;  %v1694_v39 = vadd.f32 %v1690_v26, %v174_v38 }
 0xbba   :  { %v1521_v33 = vadd.f32 %v1517_v19, %v1448_v29  ;;  %1703 = vrot.lane.b32.xlu1 %v1701_v30, %s3932_s17  ;;  %v3045_v40 = vmul.f32 -1.442695, %v1694_v39 }
 0xbbc   :  { %v3042_v18 = vmul.f32 -1.442695, %v1521_v33 }
 0xbbe   :  { %3875 = vpow2.f32 %v3042_v18 }
 0xbc8   :  { %v3876_v27 = vpop.eup %3875 }
 0xbc9   :  { %v1525_v34 = vadd.f32 1.0, %v3876_v27 }
 0xbcb   :  { %3877 = vrcp.f32 %v1525_v34 }
 0xbcc   :  { %3879 = vpow2.f32 %v3045_v40 }
 0xbd5   :  { %v3878_v35 = vpop.eup %3877  ;;  %v1531_v36 = vpop.permute.xlu0 %1530 }
 0xbd6   :  { %v1533_v37 = vmul.f32 %v3878_v35, %v1531_v36  ;;  %v3880_v41 = vpop.eup %3879  ;;  %v1540_v58 = vsub.f32 1.0, %v3878_v35  ;;  %v1546_v60 = vmul.f32 %v3878_v35, %v4303_v12 }
 0xbd7   :  { %v1698_v42 = vadd.f32 1.0, %v3880_v41 }
 0xbd8   :  { %1535 = vrot.lane.b32.xlu0 %v1533_v37, %s3932_s17  ;;  %v179_v37 = vadd.f32 %v4129_v5, %v4035_v28  ;;  %v208_v5 = vld [vmem:[%s4582_s4 + $0x80] sm:$0xff] }
 0xbd9   :  { %3881 = vrcp.f32 %v1698_v42 }
 0xbe3   :  { %v3882_v43 = vpop.eup %3881 }
 0xbe4   :  { %v1713_v13 = vsub.f32 1.0, %v3882_v43  ;;  %v1719_v1 = vmul.f32 %v3882_v43, %v4308_v62 }
 0xc2c   :  { %v1704_v45 = vpop.permute.xlu1 %1703 }
 0xc2d   :  { %v1706_v23 = vmul.f32 %v3882_v43, %v1704_v45 }
 0xc2f   :  { %1708 = vrot.lane.b32.xlu1 %v1706_v23, %s3932_s17 }
 0xc4a   :  { %v1536_v46 = vpop.permute.xlu0 %1535 }
 0xc4b   :  { %v1538_v47 = vadd.f32 %v1536_v46, %v1448_v29 }
 0xc4d   :  { %3883 = vtanh.f32 %v1538_v47 }
 0xc57   :  { %v3884_v48 = vpop.eup %3883 }
 0xc58   :  { %1542 = vrot.lane.b32.xlu0 %v3884_v48, %s3933_s18 }
 0xca1   :  { %v1709_v49 = vpop.permute.xlu1 %1708 }
 0xca2   :  { %v1711_v3 = vadd.f32 %v1709_v49, %v174_v38 }
 0xca4   :  { %3885 = vtanh.f32 %v1711_v3  ;;  %v209_v3 = vld [vmem:[%s4582_s4 + $0x88] sm:$0xff] }
 0xca5   :  { %v3735_v2 = vpack.c.bf16 %v209_v3, %v208_v5  ;;  %v215_v3 = vld [vmem:[%s4582_s4 + $0xb8] sm:$0xff] }
 0xcae   :  { %v3886_v57 = vpop.eup %3885 }
 0xcaf   :  { %1715 = vrot.lane.b32.xlu1 %v3886_v57, %s3933_s18 }
 0xcca   :  { %v1543_v59 = vpop.permute.xlu0 %1542 }
 0xccb   :  { %v1545_v61 = vmul.f32 %v1543_v59, %v1540_v58 }
 0xccd   :  { %v4362_v63 = vadd.f32 %v1546_v60, %v1545_v61 }
 0xccf   :  { %1549 = vrot.lane.b32.xlu0 %v4362_v63, %s3933_s18 }
 0xd21   :  { %v1716_v16 = vpop.permute.xlu1 %1715 }
 0xd22   :  { %v1718_v20 = vmul.f32 %v1716_v16, %v1713_v13 }
 0xd24   :  { %v4367_v15 = vadd.f32 %v1719_v1, %v1718_v20 }
 0xd26   :  { %1722 = vrot.lane.b32.xlu1 %v4367_v15, %s3933_s18 }
 0xd41   :  { %v1550_v7 = vpop.permute.xlu0 %1549 }
 0xd42   :  { %3434 = vmatmul.mubr.msk.f32.vlgmr.msra.gmra.mrb[4].mxu1 %vm62_vm1, %v1550_v7  ;;  %3467 = vmatmul.mubr.msk.f32.vlgmr.msra.gmra.mrb[24].mxu0 %vm62_vm1, %v1550_v7 }
 0xd43   :  { %3724 = vmatpush3.bf16.msra.mxu1 %v4080_v53  ;;  %3742 = vmatpush3.bf16.msra.mxu0 %v3986_v9 }
 0xd44   :  { %3725 = vmatprep.subr.bf16.mxu1 %v3929_v0  ;;  %3743 = vmatprep.subr.bf16.mxu0 %v3929_v0 }
 0xd45   :  { %3455 = vmatprep.mubr.msk.f32.mxu1 %vm3930_vm0, %v3931_v4  ;;  %3488 = vmatprep.mubr.msk.f32.mxu0 %vm3930_vm0, %v3931_v4 }
 0xd47   :  { %3727 = vmatpush3.bf16.msra.mxu1 %v4092_v56  ;;  %3745 = vmatpush3.bf16.msra.mxu0 %v3999_v14 }
 0xd48   :  { %3734 = vmatprep.subr.bf16.mxu1 %v3929_v0  ;;  %3752 = vmatprep.subr.bf16.mxu0 %v3929_v0 }
 0xd98   :  { %v1723_v12 = vpop.permute.xlu1 %1722 }
 0xd99   :  { %3456 = vmatmul.mubr.msk.f32.vlgmr.msra.gmra.mrb[12].mxu1 %vm62_vm1, %v1723_v12  ;;  %3489 = vmatmul.mubr.msk.f32.vlgmr.msra.gmra.mrb[26].mxu0 %vm62_vm1, %v1723_v12 }
 0xd9a   :  { %3754 = vmatpush3.bf16.msra.mxu0 %v4055_v44  ;;  %3477 = vmatprep.mubr.msk.f32.mxu1 %vm3930_vm0, %v3931_v4 }
 0xd9b   :  { %3755 = vmatprep.subr.bf16.mxu0 %v3929_v0  ;;  %3510 = vmatprep.mubr.msk.f32.mxu0 %vm3930_vm0, %v3931_v4 }
 0xd9c   :  { %3736 = vmatpush3.bf16.msra.mxu1 %v3735_v2 }
 0xd9d   :  { %3737 = vmatprep.subr.bf16.mxu1 %v3929_v0 }
 0xd9e   :  { %3757 = vmatpush3.bf16.msra.mxu0 %v4075_v51 }
 0xd9f   :  { %3764 = vmatprep.subr.bf16.mxu0 %v3929_v0 }
 0xda0   :  { %3739 = vmatpush3.bf16.msra.mxu1 %v3738_v52 }
 0xda1   :  { %3746 = vmatprep.subr.bf16.mxu1 %v3929_v0 }
 0xe15   :  { %v1862_v62 = vpop.f32.mrb[24].mxu0 }
 0xe16   :  { %v1873_v19 = vadd.f32 %v1862_v62, %v4142_v11  ;;  %v3468_v22 = vpop.f32.mrb[25].mxu0 }
 0xe18   :  { %1875 = vrot.lane.b32.xlu0 %v1873_v19, %s3932_s17 }
 0xe6c   :  { %v1792_v24 = vpop.f32.mrb[12].mxu1  ;;  %v2035_v25 = vpop.f32.mrb[26].mxu0 }
 0xe6d   :  { %v1793_v26 = vadd.f32 %v1792_v24, %v4158_v17  ;;  %v2046_v29 = vadd.f32 %v2035_v25, %v4026_v21  ;;  %v3457_v30 = vpop.f32.mrb[13].mxu1  ;;  %v3490_v31 = vpop.f32.mrb[27].mxu0  ;;  %v2039_v38 = vadd.f32 %v2035_v25, %v179_v37 }
 0xe6f   :  { %v1866_v32 = vadd.f32 %v1862_v62, %v1793_v26  ;;  %2048 = vrot.lane.b32.xlu1 %v2046_v29, %s3932_s17  ;;  %v3051_v39 = vmul.f32 -1.442695, %v2039_v38 }
 0xe71   :  { %v3048_v33 = vmul.f32 -1.442695, %v1866_v32 }
 0xe73   :  { %3887 = vpow2.f32 %v3048_v33 }
 0xe7d   :  { %v3888_v18 = vpop.eup %3887 }
 0xe7e   :  { %v1870_v27 = vadd.f32 1.0, %v3888_v18 }
 0xe80   :  { %3889 = vrcp.f32 %v1870_v27 }
 0xe81   :  { %3891 = vpow2.f32 %v3051_v39 }
 0xe8a   :  { %v3890_v34 = vpop.eup %3889  ;;  %v1876_v35 = vpop.permute.xlu0 %1875 }
 0xe8b   :  { %v1878_v36 = vmul.f32 %v3890_v34, %v1876_v35  ;;  %v3892_v40 = vpop.eup %3891  ;;  %v1885_v55 = vsub.f32 1.0, %v3890_v34  ;;  %v1891_v58 = vmul.f32 %v3890_v34, %v4362_v63  ;;  %v184_v35 = vadd.f32 %v4138_v10, %v4035_v28  ;;  %v212_v10 = vld [vmem:[%s4582_s4 + $0xa0] sm:$0xff] }
 0xe8c   :  { %v2043_v41 = vadd.f32 1.0, %v3892_v40 }
 0xe8d   :  { %1880 = vrot.lane.b32.xlu0 %v1878_v36, %s3932_s17 }
 0xe8e   :  { %3893 = vrcp.f32 %v2043_v41 }
 0xe98   :  { %v3894_v42 = vpop.eup %3893 }
 0xe99   :  { %v2058_v61 = vsub.f32 1.0, %v3894_v42  ;;  %v2064_v16 = vmul.f32 %v3894_v42, %v4367_v15 }
 0xee1   :  { %v2049_v43 = vpop.permute.xlu1 %2048 }
 0xee2   :  { %v2051_v45 = vmul.f32 %v3894_v42, %v2049_v43 }
 0xee4   :  { %2053 = vrot.lane.b32.xlu1 %v2051_v45, %s3932_s17 }
 0xeff   :  { %v1881_v23 = vpop.permute.xlu0 %1880 }
 0xf00   :  { %v1883_v46 = vadd.f32 %v1881_v23, %v1793_v26 }
 0xf02   :  { %3895 = vtanh.f32 %v1883_v46 }
 0xf0c   :  { %v3896_v47 = vpop.eup %3895 }
 0xf0d   :  { %1887 = vrot.lane.b32.xlu0 %v3896_v47, %s3933_s18 }
 0xf56   :  { %v2054_v48 = vpop.permute.xlu1 %2053 }
 0xf57   :  { %v2056_v49 = vadd.f32 %v2054_v48, %v179_v37  ;;  %v213_v48 = vld [vmem:[%s4582_s4 + $0xa8] sm:$0xff] }
 0xf58   :  { %v3759_v5 = vpack.c.bf16 %v213_v48, %v212_v10 }
 0xf59   :  { %3897 = vtanh.f32 %v2056_v49  ;;  %v214_v49 = vld [vmem:[%s4582_s4 + $0xb0] sm:$0xff] }
 0xf5a   :  { %v3762_v6 = vpack.c.bf16 %v215_v3, %v214_v49 }
 0xf63   :  { %v3898_v54 = vpop.eup %3897 }
 0xf64   :  { %2060 = vrot.lane.b32.xlu1 %v3898_v54, %s3933_s18 }
 0xf7f   :  { %v1888_v57 = vpop.permute.xlu0 %1887 }
 0xf80   :  { %v1890_v59 = vmul.f32 %v1888_v57, %v1885_v55 }
 0xf82   :  { %v4421_v60 = vadd.f32 %v1891_v58, %v1890_v59 }
 0xf84   :  { %1894 = vrot.lane.b32.xlu0 %v4421_v60, %s3933_s18 }
 0xfd6   :  { %v2061_v13 = vpop.permute.xlu1 %2060 }
 0xfd7   :  { %v2063_v1 = vmul.f32 %v2061_v13, %v2058_v61 }
 0xfd9   :  { %v4426_v20 = vadd.f32 %v2064_v16, %v2063_v1 }
 0xfdb   :  { %2067 = vrot.lane.b32.xlu1 %v4426_v20, %s3933_s18 }
 0xff6   :  { %v1895_v7 = vpop.permute.xlu0 %1894 }
 0xff7   :  { %3478 = vmatmul.mubr.msk.f32.vlgmr.msra.gmra.mrb[4].mxu1 %vm62_vm1, %v1895_v7  ;;  %3511 = vmatmul.mubr.msk.f32.vlgmr.msra.gmra.mrb[28].mxu0 %vm62_vm1, %v1895_v7 }
 0xff8   :  { %3748 = vmatpush3.bf16.msra.mxu1 %v4080_v53  ;;  %3766 = vmatpush3.bf16.msra.mxu0 %v3986_v9 }
 0xff9   :  { %3749 = vmatprep.subr.bf16.mxu1 %v3929_v0  ;;  %3767 = vmatprep.subr.bf16.mxu0 %v3929_v0 }
 0xffa   :  { %3499 = vmatprep.mubr.msk.f32.mxu1 %vm3930_vm0, %v3931_v4  ;;  %3532 = vmatprep.mubr.msk.f32.mxu0 %vm3930_vm0, %v3931_v4 }
 0xffc   :  { %3751 = vmatpush3.bf16.msra.mxu1 %v4092_v56  ;;  %3769 = vmatpush3.bf16.msra.mxu0 %v3999_v14 }
 0xffd   :  { %3758 = vmatprep.subr.bf16.mxu1 %v3929_v0  ;;  %3776 = vmatprep.subr.bf16.mxu0 %v3929_v0 }
0x104d   :  { %v2068_v63 = vpop.permute.xlu1 %2067 }
0x104e   :  { %3500 = vmatmul.mubr.msk.f32.vlgmr.msra.gmra.mrb[14].mxu1 %vm62_vm1, %v2068_v63  ;;  %3533 = vmatmul.mubr.msk.f32.vlgmr.msra.gmra.mrb[30].mxu0 %vm62_vm1, %v2068_v63 }
0x104f   :  { %3778 = vmatpush3.bf16.msra.mxu0 %v4055_v44  ;;  %3521 = vmatprep.mubr.msk.f32.mxu1 %vm3930_vm0, %v3931_v4 }
0x1050   :  { %3779 = vmatprep.subr.bf16.mxu0 %v3929_v0  ;;  %3554 = vmatprep.mubr.msk.f32.mxu0 %vm3930_vm0, %v3931_v4 }
0x1051   :  { %3760 = vmatpush3.bf16.msra.mxu1 %v3759_v5 }
0x1052   :  { %3761 = vmatprep.subr.bf16.mxu1 %v3929_v0 }
0x1053   :  { %3781 = vmatpush3.bf16.msra.mxu0 %v4075_v51 }
0x1054   :  { %3788 = vmatprep.subr.bf16.mxu0 %v3929_v0 }
0x1055   :  { %3763 = vmatpush3.bf16.msra.mxu1 %v3762_v6 }
0x1056   :  { %3770 = vmatprep.subr.bf16.mxu1 %v3929_v0 }
0x10ca   :  { %v2207_v15 = vpop.f32.mrb[28].mxu0 }
0x10cb   :  { %v2218_v12 = vadd.f32 %v2207_v15, %v4142_v11  ;;  %v3512_v62 = vpop.f32.mrb[29].mxu0 }
0x10cd   :  { %2220 = vrot.lane.b32.xlu0 %v2218_v12, %s3932_s17 }
0x1121   :  { %v2137_v19 = vpop.f32.mrb[14].mxu1  ;;  %v2380_v22 = vpop.f32.mrb[30].mxu0 }
0x1122   :  { %v2138_v24 = vadd.f32 %v2137_v19, %v4158_v17  ;;  %v2391_v25 = vadd.f32 %v2380_v22, %v4026_v21  ;;  %v3501_v26 = vpop.f32.mrb[15].mxu1  ;;  %v3534_v29 = vpop.f32.mrb[31].mxu0  ;;  %v2384_v36 = vadd.f32 %v2380_v22, %v184_v35 }
0x1124   :  { %v2211_v30 = vadd.f32 %v2207_v15, %v2138_v24  ;;  %2393 = vrot.lane.b32.xlu1 %v2391_v25, %s3932_s17  ;;  %v3057_v37 = vmul.f32 -1.442695, %v2384_v36 }
0x1126   :  { %v3054_v31 = vmul.f32 -1.442695, %v2211_v30  ;;  %v189_v30 = vadd.f32 %v4136_v8, %v4035_v28  ;;  %v216_v28 = vld [vmem:[%s4582_s4 + $0xc0] sm:$0xff]  ;;  %v217_v8 = vld [vmem:[%s4582_s4 + $0xc8] sm:$0xff] }
0x1128   :  { %3899 = vpow2.f32 %v3054_v31 }
0x1132   :  { %v3900_v32 = vpop.eup %3899 }
0x1133   :  { %v2215_v33 = vadd.f32 1.0, %v3900_v32 }
0x1135   :  { %3901 = vrcp.f32 %v2215_v33 }
0x1136   :  { %3903 = vpow2.f32 %v3057_v37 }
0x113f   :  { %v3902_v18 = vpop.eup %3901  ;;  %v2221_v27 = vpop.permute.xlu0 %2220 }
0x1140   :  { %v2223_v34 = vmul.f32 %v3902_v18, %v2221_v27  ;;  %v3904_v38 = vpop.eup %3903  ;;  %v2230_v50 = vsub.f32 1.0, %v3902_v18  ;;  %v2236_v54 = vmul.f32 %v3902_v18, %v4421_v60 }
0x1141   :  { %v2388_v39 = vadd.f32 1.0, %v3904_v38 }
0x1142   :  { %2225 = vrot.lane.b32.xlu0 %v2223_v34, %s3932_s17 }
0x1143   :  { %3905 = vrcp.f32 %v2388_v39 }
0x114d   :  { %v3906_v40 = vpop.eup %3905 }
0x114e   :  { %v2403_v58 = vsub.f32 1.0, %v3906_v40  ;;  %v2409_v61 = vmul.f32 %v3906_v40, %v4426_v20 }
0x1196   :  { %v2394_v41 = vpop.permute.xlu1 %2393 }
0x1197   :  { %v2396_v42 = vmul.f32 %v3906_v40, %v2394_v41  ;;  %v218_v40 = vld [vmem:[%s4582_s4 + $0xd0] sm:$0xff]  ;;  %v3783_v41 = vpack.c.bf16 %v217_v8, %v216_v28 }
0x1199   :  { %2398 = vrot.lane.b32.xlu1 %v2396_v42, %s3932_s17  ;;  %v219_v42 = vld [vmem:[%s4582_s4 + $0xd8] sm:$0xff] }
0x11b4   :  { %v2226_v43 = vpop.permute.xlu0 %2225 }
0x11b5   :  { %v2228_v45 = vadd.f32 %v2226_v43, %v2138_v24  ;;  %v3786_v43 = vpack.c.bf16 %v219_v42, %v218_v40 }
0x11b7   :  { %3907 = vtanh.f32 %v2228_v45 }
0x11c1   :  { %v3908_v23 = vpop.eup %3907 }
0x11c2   :  { %2232 = vrot.lane.b32.xlu0 %v3908_v23, %s3933_s18 }
0x120b   :  { %v2399_v46 = vpop.permute.xlu1 %2398 }
0x120c   :  { %v2401_v47 = vadd.f32 %v2399_v46, %v184_v35 }
0x120e   :  { %3909 = vtanh.f32 %v2401_v47 }
0x1218   :  { %v3910_v2 = vpop.eup %3909 }
0x1219   :  { %2405 = vrot.lane.b32.xlu1 %v3910_v2, %s3933_s18 }
0x1234   :  { %v2233_v52 = vpop.permute.xlu0 %2232 }
0x1235   :  { %v2235_v55 = vmul.f32 %v2233_v52, %v2230_v50 }
0x1237   :  { %v4480_v57 = vadd.f32 %v2236_v54, %v2235_v55 }
0x1239   :  { %2239 = vrot.lane.b32.xlu0 %v4480_v57, %s3933_s18 }
0x128b   :  { %v2406_v59 = vpop.permute.xlu1 %2405 }
0x128c   :  { %v2408_v13 = vmul.f32 %v2406_v59, %v2403_v58 }
0x128e   :  { %v4485_v16 = vadd.f32 %v2409_v61, %v2408_v13 }
0x1290   :  { %2412 = vrot.lane.b32.xlu1 %v4485_v16, %s3933_s18 }
0x12ab   :  { %v2240_v1 = vpop.permute.xlu0 %2239 }
0x12ac   :  { %3522 = vmatmul.mubr.msk.f32.vlgmr.msra.gmra.mrb[4].mxu1 %vm62_vm1, %v2240_v1  ;;  %3555 = vmatmul.mubr.msk.f32.vlgmr.msra.gmra.mrb[32].mxu0 %vm62_vm1, %v2240_v1 }
0x12ad   :  { %3772 = vmatpush3.bf16.msra.mxu1 %v4080_v53  ;;  %3790 = vmatpush3.bf16.msra.mxu0 %v3986_v9 }
0x12ae   :  { %3773 = vmatprep.subr.bf16.mxu1 %v3929_v0  ;;  %3791 = vmatprep.subr.bf16.mxu0 %v3929_v0 }
0x12af   :  { %3543 = vmatprep.mubr.msk.f32.mxu1 %vm3930_vm0, %v3931_v4  ;;  %3576 = vmatprep.mubr.msk.f32.mxu0 %vm3930_vm0, %v3931_v4 }
0x12b1   :  { %3775 = vmatpush3.bf16.msra.mxu1 %v4092_v56  ;;  %3793 = vmatpush3.bf16.msra.mxu0 %v3999_v14 }
0x12b2   :  { %3782 = vmatprep.subr.bf16.mxu1 %v3929_v0  ;;  %3800 = vmatprep.subr.bf16.mxu0 %v3929_v0 }
0x1302   :  { %v2413_v60 = vpop.permute.xlu1 %2412 }
0x1303   :  { %3544 = vmatmul.mubr.msk.f32.vlgmr.msra.gmra.mrb[16].mxu1 %vm62_vm1, %v2413_v60  ;;  %3577 = vmatmul.mubr.msk.f32.vlgmr.msra.gmra.mrb[34].mxu0 %vm62_vm1, %v2413_v60 }
0x1304   :  { %3802 = vmatpush3.bf16.msra.mxu0 %v4055_v44  ;;  %3565 = vmatprep.mubr.msk.f32.mxu1 %vm3930_vm0, %v3931_v4 }
0x1305   :  { %3803 = vmatprep.subr.bf16.mxu0 %v3929_v0  ;;  %3598 = vmatprep.mubr.msk.f32.mxu0 %vm3930_vm0, %v3931_v4 }
0x1306   :  { %3784 = vmatpush3.bf16.msra.mxu1 %v3783_v41 }
0x1307   :  { %3785 = vmatprep.subr.bf16.mxu1 %v3929_v0 }
0x1308   :  { %3805 = vmatpush3.bf16.msra.mxu0 %v4075_v51 }
0x130a   :  { %3787 = vmatpush3.bf16.msra.mxu1 %v3786_v43 }
0x130b   :  { %3794 = vmatprep.subr.bf16.mxu1 %v3929_v0 }
0x137f   :  { %v2552_v9 = vpop.f32.mrb[32].mxu0 }
0x1380   :  { %v2563_v14 = vadd.f32 %v2552_v9, %v4142_v11  ;;  %v3556_v20 = vpop.f32.mrb[33].mxu0 }
0x1381   :  { %v222_v20 = vld [vmem:[%s4582_s4 + $0xf0] sm:$0xff] }
0x1382   :  { %2565 = vrot.lane.b32.xlu0 %v2563_v14, %s3932_s17  ;;  %v220_v14 = vld [vmem:[%s4582_s4 + $0xe0] sm:$0xff] }
0x13d6   :  { %v2482_v7 = vpop.f32.mrb[16].mxu1  ;;  %v2725_v63 = vpop.f32.mrb[34].mxu0 }
0x13d7   :  { %v2483_v44 = vadd.f32 %v2482_v7, %v4158_v17  ;;  %v2736_v15 = vadd.f32 %v2725_v63, %v4026_v21  ;;  %v3545_v12 = vpop.f32.mrb[17].mxu1  ;;  %v3578_v62 = vpop.f32.mrb[35].mxu0  ;;  %v2729_v31 = vadd.f32 %v2725_v63, %v189_v30  ;;  %v223_v63 = vld [vmem:[%s4582_s4 + $0xf8] sm:$0xff] }
0x13d9   :  { %v2556_v19 = vadd.f32 %v2552_v9, %v2483_v44  ;;  %2738 = vrot.lane.b32.xlu1 %v2736_v15, %s3932_s17  ;;  %v3063_v21 = vmul.f32 -1.442695, %v2729_v31 }
0x13db   :  { %v3060_v22 = vmul.f32 -1.442695, %v2556_v19 }
0x13dd   :  { %3911 = vpow2.f32 %v3060_v22 }
0x13e7   :  { %v3912_v51 = vpop.eup %3911 }
0x13e8   :  { %v2560_v24 = vadd.f32 1.0, %v3912_v51 }
0x13ea   :  { %3913 = vrcp.f32 %v2560_v24 }
0x13eb   :  { %3915 = vpow2.f32 %v3063_v21 }
0x13f4   :  { %v3914_v25 = vpop.eup %3913  ;;  %v2566_v26 = vpop.permute.xlu0 %2565 }
0x13f5   :  { %v2568_v29 = vmul.f32 %v3914_v25, %v2566_v26  ;;  %v3916_v32 = vpop.eup %3915  ;;  %v2575_v23 = vsub.f32 1.0, %v3914_v25  ;;  %v2581_v47 = vmul.f32 %v3914_v25, %v4480_v57  ;;  %v3018_v25 = vld [vmem:[%s4582_s4 + $0x100] ss:$0 sm:$0xff] }
0x13f6   :  { %v2733_v33 = vadd.f32 1.0, %v3916_v32 }
0x13f7   :  { %2570 = vrot.lane.b32.xlu0 %v2568_v29, %s3932_s17 }
0x13f8   :  { %3917 = vrcp.f32 %v2733_v33 }
0x1402   :  { %v3918_v18 = vpop.eup %3917 }
0x1403   :  { %v2748_v49 = vsub.f32 1.0, %v3918_v18  ;;  %v2754_v3 = vmul.f32 %v3918_v18, %v4485_v16 }
0x144b   :  { %v2739_v27 = vpop.permute.xlu1 %2738 }
0x144c   :  { %v2741_v34 = vmul.f32 %v3918_v18, %v2739_v27 }
0x144e   :  { %2743 = vrot.lane.b32.xlu1 %v2741_v34, %s3932_s17 }
0x1469   :  { %v2571_v35 = vpop.permute.xlu0 %2570 }
0x146a   :  { %v2573_v36 = vadd.f32 %v2571_v35, %v2483_v44  ;;  %v3810_v44 = vpack.c.bf16 %v223_v63, %v222_v20 }
0x146c   :  { %3919 = vtanh.f32 %v2573_v36 }
0x1476   :  { %v3920_v37 = vpop.eup %3919 }
0x1477   :  { %2577 = vrot.lane.b32.xlu0 %v3920_v37, %s3933_s18 }
0x14c0   :  { %v2744_v38 = vpop.permute.xlu1 %2743 }
0x14c1   :  { %v2746_v39 = vadd.f32 %v2744_v38, %v189_v30 }
0x14c3   :  { %3921 = vtanh.f32 %v2746_v39 }
0x14cd   :  { %v3922_v45 = vpop.eup %3921 }
0x14ce   :  { %2750 = vrot.lane.b32.xlu1 %v3922_v45, %s3933_s18 }
0x14e9   :  { %v2578_v46 = vpop.permute.xlu0 %2577 }
0x14ea   :  { %v2580_v10 = vmul.f32 %v2578_v46, %v2575_v23 }
0x14ec   :  { %v2582_v48 = vadd.f32 %v2581_v47, %v2580_v10 }
0x14ee   :  { %2584 = vrot.lane.b32.xlu0 %v2582_v48, %s3933_s18 }
0x1540   :  { %v2751_v5 = vpop.permute.xlu1 %2750 }
0x1541   :  { %v2753_v6 = vmul.f32 %v2751_v5, %v2748_v49 }
0x1543   :  { %v2755_v2 = vadd.f32 %v2754_v3, %v2753_v6 }
0x1545   :  { %2757 = vrot.lane.b32.xlu1 %v2755_v2, %s3933_s18 }
0x1560   :  { %v2585_v50 = vpop.permute.xlu0 %2584 }
0x1561   :  { %3566 = vmatmul.mubr.msk.f32.vlgmr.msra.gmra.mrb[4].mxu1 %vm62_vm1, %v2585_v50  ;;  %3599 = vmatmul.mubr.msk.f32.vlgmr.msra.gmra.mrb[36].mxu0 %vm62_vm1, %v2585_v50 }
0x1562   :  { %3796 = vmatpush3.bf16.msra.mxu1 %v4080_v53  ;;  %3587 = vmatprep.mubr.msk.f32.mxu1 %vm3930_vm0, %v3931_v4 }
0x1563   :  { %3797 = vmatprep.subr.bf16.mxu1 %v3929_v0 }
0x1566   :  { %3799 = vmatpush3.bf16.msra.mxu1 %v4092_v56 }
0x1567   :  { %3806 = vmatprep.subr.bf16.mxu1 %v3929_v0 }
0x15b7   :  { %v2758_v52 = vpop.permute.xlu1 %2757 }
0x15b8   :  { %3588 = vmatmul.mubr.msk.f32.vlgmr.msra.gmra.mrb[18].mxu1 %vm62_vm1, %v2758_v52 }
0x15b9   :  { %3609 = vmatprep.mubr.msk.f32.mxu1 %vm3930_vm0, %v3931_v4 }
0x1634   :  { %v2897_v54 = vpop.f32.mrb[36].mxu0 }
0x1635   :  { %v2908_v55 = vadd.f32 %v2897_v54, %v4142_v11  ;;  %v3600_v57 = vpop.f32.mrb[37].mxu0 }
0x1637   :  { %2910 = vrot.lane.b32.xlu0 %v2908_v55, %s3932_s17 }
0x168b   :  { %v2827_v53 = vpop.f32.mrb[18].mxu1 }
0x168c   :  { %v2828_v58 = vadd.f32 %v2827_v53, %v4158_v17  ;;  %v3589_v59 = vpop.f32.mrb[19].mxu1  ;;  %v221_v17 = vld [vmem:[%s4582_s4 + $0xe8] sm:$0xff] }
0x168d   :  { %v3807_v7 = vpack.c.bf16 %v221_v17, %v220_v14 }
0x168e   :  { %v2901_v61 = vadd.f32 %v2897_v54, %v2828_v58 }
0x168f   :  { %3808 = vmatpush3.bf16.msra.mxu1 %v3807_v7 }
0x1690   :  { %v3066_v56 = vmul.f32 -1.442695, %v2901_v61  ;;  %3809 = vmatprep.subr.bf16.mxu1 %v3929_v0 }
0x1692   :  { %3923 = vpow2.f32 %v3066_v56 }
0x1693   :  { %3811 = vmatpush3.bf16.msra.mxu1 %v3810_v44 }
0x169c   :  { %v3924_v13 = vpop.eup %3923 }
0x169d   :  { %v2905_v16 = vadd.f32 1.0, %v3924_v13 }
0x169f   :  { %3925 = vrcp.f32 %v2905_v16 }
0x16a9   :  { %v3926_v1 = vpop.eup %3925  ;;  %v2911_v60 = vpop.permute.xlu0 %2910 }
0x16aa   :  { %v2913_v9 = vmul.f32 %v3926_v1, %v2911_v60  ;;  %v2920_v12 = vsub.f32 1.0, %v3926_v1  ;;  %v2926_v19 = vmul.f32 %v3926_v1, %v2582_v48 }
0x16ac   :  { %2915 = vrot.lane.b32.xlu1 %v2913_v9, %s3932_s17 }
0x171e   :  { %v2916_v4 = vpop.permute.xlu1 %2915 }
0x171f   :  { %v2918_v11 = vadd.f32 %v2916_v4, %v2828_v58 }
0x1721   :  { %3927 = vtanh.f32 %v2918_v11 }
0x172b   :  { %v3928_v15 = vpop.eup %3927 }
0x172c   :  { %2922 = vrot.lane.b32.xlu0 %v3928_v15, %s3933_s18 }
0x179e   :  { %v2923_v62 = vpop.permute.xlu0 %2922 }
0x179f   :  { %v2925_v22 = vmul.f32 %v2923_v62, %v2920_v12 }
0x17a1   :  { %v2927_v51 = vadd.f32 %v2926_v19, %v2925_v22 }
0x17a3   :  { %2929 = vrot.lane.b32.xlu1 %v2927_v51, %s3933_s18 }
0x1815   :  { %v2930_v24 = vpop.permute.xlu1 %2929 }
0x1816   :  { %3610 = vmatmul.mubr.msk.f32.vlgmr.msra.gmra.mrb[4].mxu1 %vm62_vm1, %v2930_v24 }
0x18e9   :  { %v2999_v26 = vpop.f32.mrb[4].mxu1 }
0x18ea   :  { %v3812_v0 = vadd.f32 %v3018_v25, %v2999_v26  ;;  %v3611_v29 = vpop.f32.mrb[5].mxu1 }
0x18ec   :  { %3005 = vst.msk [vmem:[%s4583_s5] sm:$0xff] %vm3004_vm2, %v3812_v0 }

</bundles_post_ra>
